<compile_context>
chip_gen: v5e
topology: v5e:2x2
jax: 0.10.0
libtpu: 0.0.40
codegen_flags: <defaults>
</compile_context>

<pallas_src>
import functools

import jax
import jax.numpy as jnp
from jax.experimental import pallas as pl
from jax.experimental.pallas import tpu as pltpu

HIDDEN = 256


def _round_up(n, m):
    return ((n + m - 1) // m) * m


def _cdiv(a, b):
    return (a + b - 1) // b


def _use_bf16_eltwise():
    """bf16 VPU elementwise path on v6e/v7x; f32 on v5e and older."""
    try:
        kind = jax.devices()[0].device_kind.lower()
    except Exception:
        return False
    if not ("tpu" in kind or "v6" in kind or "v7" in kind):
        return False
    for old in ("v2", "v3", "v4", "v5"):
        if old in kind:
            return False
    return True


def critic_kernel(x_ref, w1_ref, b1_ref, w2_ref, b2_ref, w3_ref, b3_ref, o_ref,
                  *, bf16_vpu):
    # x_ref: (TILE_B, D) f32 ; w1: (256, D) bf16 ; w2: (256, 256) bf16
    # b1/b2/w3: (256, 1) f32 ; b3: (1, 1) f32 ; o_ref: (1, TILE_B) f32
    x = x_ref[...].astype(jnp.bfloat16)  # per-tile cast (no wrapper pass)

    # fc1: W1 @ X^T (contraction on both last axes -> (256, TILE_B), batch on
    # lanes), MXU bf16 operands with f32 accumulation.
    h1 = jax.lax.dot_general(
        w1_ref[...], x, (((1,), (1,)), ((), ())),
        preferred_element_type=jnp.float32)

    if bf16_vpu:
        # v6e/v7x: bf16 VPU -> bias/ReLU/fc3-multiply on packed bf16 vregs.
        h1 = jnp.maximum(h1.astype(jnp.bfloat16) + b1_ref[...].astype(jnp.bfloat16), 0.0)
        h2 = jnp.dot(w2_ref[...], h1, preferred_element_type=jnp.float32)
        h2 = jnp.maximum(h2.astype(jnp.bfloat16) + b2_ref[...].astype(jnp.bfloat16), 0.0)
        prod = (h2 * w3_ref[...].astype(jnp.bfloat16)).astype(jnp.float32)
    else:
        # v5e: no bf16 VPU -> keep elementwise math in f32.
        h1 = jnp.maximum(h1 + b1_ref[...], 0.0)
        h2 = jnp.dot(w2_ref[...], h1.astype(jnp.bfloat16),
                     preferred_element_type=jnp.float32)
        h2 = jnp.maximum(h2 + b2_ref[...], 0.0)
        prod = h2 * w3_ref[...]

    # fc3 (N=1): VPU multiply + sublane (XLU) reduction in f32; lane-dense
    # (1, TILE_B) output -> unmasked stores.
    out = jnp.sum(prod, axis=0, keepdims=True) + b3_ref[...]
    o_ref[...] = out.astype(o_ref.dtype)


def critic_forward(x, params, *, tile_b=8192):
    """x: (B, input_dim) f32 -> (B, 1) f32."""
    w1, b1, w2, b2, w3, b3 = params
    B, D = x.shape
    bf16_vpu = _use_bf16_eltwise()

    # MXU-/lane-aligned batch tile (multiple of 256), capped for small batches.
    TILE_B = min(_round_up(tile_b, 256), _round_up(B, 256))
    # v7x megacore: keep >= 2 grid steps when the batch allows it so the
    # "parallel" axis shards across both TensorCores.
    if _cdiv(B, TILE_B) < 2 and TILE_B > 256:
        TILE_B = max(256, _round_up(_cdiv(B, 2), 256))
    B_pad = _round_up(B, TILE_B)
    grid = (B_pad // TILE_B,)

    # Only a cheap batch pad (no transpose / cast pass over x).
    if B_pad != B:
        x = jnp.pad(x, ((0, B_pad - B), (0, 0)))

    kernel = functools.partial(critic_kernel, bf16_vpu=bf16_vpu)

    out = pl.pallas_call(
        kernel,
        out_shape=jax.ShapeDtypeStruct((1, B_pad), jnp.float32),
        grid_spec=pltpu.PrefetchScalarGridSpec(
            num_scalar_prefetch=0,
            grid=grid,
            in_specs=[
                pl.BlockSpec((TILE_B, D), lambda i: (i, 0)),        # x tile (streamed)
                pl.BlockSpec((HIDDEN, D), lambda i: (0, 0)),        # w1 (VMEM-resident)
                pl.BlockSpec((HIDDEN, 1), lambda i: (0, 0)),        # b1
                pl.BlockSpec((HIDDEN, HIDDEN), lambda i: (0, 0)),   # w2 (VMEM-resident)
                pl.BlockSpec((HIDDEN, 1), lambda i: (0, 0)),        # b2
                pl.BlockSpec((HIDDEN, 1), lambda i: (0, 0)),        # w3 column
                pl.BlockSpec((1, 1), lambda i: (0, 0)),             # b3
            ],
            out_specs=pl.BlockSpec((1, TILE_B), lambda i: (0, i)),  # lane-dense output
        ),
        compiler_params=pltpu.CompilerParams(
            dimension_semantics=("parallel",),
            vmem_limit_bytes=48 * 1024 * 1024,
        ),
    )(x, w1, b1, w2, b2, w3, b3)

    return out[0, :B].reshape(B, 1)


def init_linear(key, fan_in, fan_out, *, w_dtype=jnp.float32):
    # Mimics PyTorch nn.Linear defaults: weight, bias ~ U(-1/sqrt(fan_in), 1/sqrt(fan_in)).
    # Weight in PyTorch layout (out_features, in_features); bias as (out, 1) column.
    kw, kb = jax.random.split(key)
    bound = 1.0 / jnp.sqrt(jnp.float32(fan_in))
    w = jax.random.uniform(kw, (fan_out, fan_in), jnp.float32, -bound, bound)
    b = jax.random.uniform(kb, (fan_out, 1), jnp.float32, -bound, bound)
    return w.astype(w_dtype), b


def make_params(key, input_dim):
    k1, k2, k3 = jax.random.split(key, 3)
    w1, b1 = init_linear(k1, input_dim, HIDDEN, w_dtype=jnp.bfloat16)  # MXU operand
    w2, b2 = init_linear(k2, HIDDEN, HIDDEN, w_dtype=jnp.bfloat16)     # MXU operand
    w3, b3 = init_linear(k3, HIDDEN, 1, w_dtype=jnp.float32)
    w3 = w3.reshape(HIDDEN, 1)   # (256, 1) column for the VPU fc3
    b3 = b3.reshape(1, 1)
    return (w1, b1, w2, b2, w3, b3)


def reference_forward(x, params, *, bf16_vpu):
    # Pure-JAX reference replaying the kernel math (same cast points).
    w1, b1, w2, b2, w3, b3 = params
    xb = x.astype(jnp.bfloat16)
    h1 = jax.lax.dot_general(w1, xb, (((1,), (1,)), ((), ())),
                             preferred_element_type=jnp.float32)       # (256, B)
    if bf16_vpu:
        h1 = jnp.maximum(h1.astype(jnp.bfloat16) + b1.astype(jnp.bfloat16), 0.0)
        h2 = jnp.dot(w2, h1, preferred_element_type=jnp.float32)
        h2 = jnp.maximum(h2.astype(jnp.bfloat16) + b2.astype(jnp.bfloat16), 0.0)
        prod = (h2 * w3.astype(jnp.bfloat16)).astype(jnp.float32)
    else:
        h1 = jnp.maximum(h1 + b1, 0.0)
        h2 = jnp.dot(w2, h1.astype(jnp.bfloat16), preferred_element_type=jnp.float32)
        h2 = jnp.maximum(h2 + b2, 0.0)
        prod = h2 * w3
    out = jnp.sum(prod, axis=0, keepdims=True) + b3                    # (1, B)
    return out.T                                                       # (B, 1)


if __name__ == "__main__":
    key = jax.random.PRNGKey(0)
    kx, kp = jax.random.split(key)

    batch, input_dim = 8, 16  # small shapes consistent with Critic(input_dim=16)
    x = jax.random.normal(kx, (batch, input_dim), jnp.float32)
    params = make_params(kp, input_dim)

    out = critic_forward(x, params)
    out = jax.block_until_ready(out)

    ref = reference_forward(x, params, bf16_vpu=_use_bf16_eltwise())
    assert out.shape == (batch, 1)
    assert jnp.allclose(out, ref, atol=2e-3, rtol=2e-3), (
        f"max abs err = {jnp.max(jnp.abs(out - ref))}")

    # TODO(synk): optimizer (Adam) / training step from the PyTorch module is not
    # part of the forward pass and is not implemented here.
    print("KERNEL_OK")
</pallas_src>

<mosaic_0001>
module attributes {stable_mosaic.version = 11 : i64} {
  func.func @critic_kernel(%arg0: i32, %arg1: memref<256x16xf32, #tpu.memory_space<vmem>>, %arg2: memref<256x16xbf16, #tpu.memory_space<vmem>>, %arg3: memref<256x1xf32, #tpu.memory_space<vmem>>, %arg4: memref<256x256xbf16, #tpu.memory_space<vmem>>, %arg5: memref<256x1xf32, #tpu.memory_space<vmem>>, %arg6: memref<256x1xf32, #tpu.memory_space<vmem>>, %arg7: memref<1x1xf32, #tpu.memory_space<vmem>>, %arg8: memref<1x256xf32, #tpu.memory_space<vmem>>) attributes {dimension_semantics = [#tpu.dimension_semantics<parallel>], iteration_bounds = array<i64: 1>, scalar_prefetch = 0 : i64, scratch_operands = 0 : i64, tpu.core_type = #tpu.core_type<tc>, window_params = [{transform_indices = @transform_0, window_bounds = array<i64: 256, 16>}, {pipeline_mode = #tpu.pipeline_mode<synchronous>, transform_indices = @transform_1, window_bounds = array<i64: 256, 16>}, {pipeline_mode = #tpu.pipeline_mode<synchronous>, transform_indices = @transform_2, window_bounds = array<i64: 256, 1>}, {pipeline_mode = #tpu.pipeline_mode<synchronous>, transform_indices = @transform_3, window_bounds = array<i64: 256, 256>}, {pipeline_mode = #tpu.pipeline_mode<synchronous>, transform_indices = @transform_4, window_bounds = array<i64: 256, 1>}, {pipeline_mode = #tpu.pipeline_mode<synchronous>, transform_indices = @transform_5, window_bounds = array<i64: 256, 1>}, {pipeline_mode = #tpu.pipeline_mode<synchronous>, transform_indices = @transform_6, window_bounds = array<i64: 1, 1>}, {transform_indices = @transform_7, window_bounds = array<i64: 1, 256>}]} {
    %c0 = arith.constant 0 : index
    %c0_0 = arith.constant 0 : index
    %0 = vector.load %arg1[%c0, %c0_0] : memref<256x16xf32, #tpu.memory_space<vmem>>, vector<256x16xf32>
    %1 = arith.truncf %0 : vector<256x16xf32> to vector<256x16xbf16>
    %c0_1 = arith.constant 0 : index
    %c0_2 = arith.constant 0 : index
    %2 = vector.load %arg2[%c0_1, %c0_2] : memref<256x16xbf16, #tpu.memory_space<vmem>>, vector<256x16xbf16>
    %cst = arith.constant dense<0.000000e+00> : vector<256x256xf32>
    %3 = tpu.matmul %2, %1, %cst {dimension_numbers = #tpu.dot_dimension_numbers<[1], [1], [0], [0], [0, 0, 1, 0], [], []>} : vector<256x16xbf16>, vector<256x16xbf16>, vector<256x256xf32> -> vector<256x256xf32>
    %c0_3 = arith.constant 0 : index
    %c0_4 = arith.constant 0 : index
    %4 = vector.load %arg3[%c0_3, %c0_4] : memref<256x1xf32, #tpu.memory_space<vmem>>, vector<256x1xf32>
    %5 = vector.broadcast %4 : vector<256x1xf32> to vector<256x256xf32>
    %6 = arith.addf %3, %5 : vector<256x256xf32>
    %cst_5 = arith.constant 0.000000e+00 : f32
    %7 = vector.broadcast %cst_5 : f32 to vector<256x256xf32>
    %8 = arith.maximumf %6, %7 : vector<256x256xf32>
    %c0_6 = arith.constant 0 : index
    %c0_7 = arith.constant 0 : index
    %9 = vector.load %arg4[%c0_6, %c0_7] : memref<256x256xbf16, #tpu.memory_space<vmem>>, vector<256x256xbf16>
    %10 = arith.truncf %8 : vector<256x256xf32> to vector<256x256xbf16>
    %cst_8 = arith.constant dense<0.000000e+00> : vector<256x256xf32>
    %11 = tpu.matmul %9, %10, %cst_8 {dimension_numbers = #tpu.dot_dimension_numbers<[1], [0], [0], [1], [0, 0, 1, 1], [], []>} : vector<256x256xbf16>, vector<256x256xbf16>, vector<256x256xf32> -> vector<256x256xf32>
    %c0_9 = arith.constant 0 : index
    %c0_10 = arith.constant 0 : index
    %12 = vector.load %arg5[%c0_9, %c0_10] : memref<256x1xf32, #tpu.memory_space<vmem>>, vector<256x1xf32>
    %13 = vector.broadcast %12 : vector<256x1xf32> to vector<256x256xf32>
    %14 = arith.addf %11, %13 : vector<256x256xf32>
    %cst_11 = arith.constant 0.000000e+00 : f32
    %15 = vector.broadcast %cst_11 : f32 to vector<256x256xf32>
    %16 = arith.maximumf %14, %15 : vector<256x256xf32>
    %c0_12 = arith.constant 0 : index
    %c0_13 = arith.constant 0 : index
    %17 = vector.load %arg6[%c0_12, %c0_13] : memref<256x1xf32, #tpu.memory_space<vmem>>, vector<256x1xf32>
    %18 = vector.broadcast %17 : vector<256x1xf32> to vector<256x256xf32>
    %19 = arith.mulf %16, %18 : vector<256x256xf32>
    %cst_14 = arith.constant dense<0.000000e+00> : vector<256xf32>
    %20 = vector.multi_reduction <add>, %19, %cst_14 [0] : vector<256x256xf32> to vector<256xf32>
    %21 = vector.shape_cast %20 : vector<256xf32> to vector<1x256xf32>
    %c0_15 = arith.constant 0 : index
    %c0_16 = arith.constant 0 : index
    %22 = vector.load %arg7[%c0_15, %c0_16] : memref<1x1xf32, #tpu.memory_space<vmem>>, vector<1x1xf32>
    %23 = vector.broadcast %22 : vector<1x1xf32> to vector<1x256xf32>
    %24 = arith.addf %21, %23 : vector<1x256xf32>
    %c0_17 = arith.constant 0 : index
    %c0_18 = arith.constant 0 : index
    %25 = vector.load %arg8[%c0_17, %c0_18] : memref<1x256xf32, #tpu.memory_space<vmem>>, vector<1x256xf32>
    tpu.vector_store %arg8[%c0_17, %c0_18], %24 {strides = array<i32>} : memref<1x256xf32, #tpu.memory_space<vmem>>, vector<1x256xf32>,
    return
  }
  func.func @transform_0(%arg0: i32) -> (i32, i32) {
    %c0_i32 = arith.constant 0 : i32
    %c0_i32_0 = arith.constant 0 : i32
    return %arg0, %c0_i32 : i32, i32
  }
  func.func @transform_1(%arg0: i32) -> (i32, i32) {
    %c0_i32 = arith.constant 0 : i32
    %c0_i32_0 = arith.constant 0 : i32
    %c0_i32_1 = arith.constant 0 : i32
    return %c0_i32, %c0_i32_0 : i32, i32
  }
  func.func @transform_2(%arg0: i32) -> (i32, i32) {
    %c0_i32 = arith.constant 0 : i32
    %c0_i32_0 = arith.constant 0 : i32
    %c0_i32_1 = arith.constant 0 : i32
    return %c0_i32, %c0_i32_0 : i32, i32
  }
  func.func @transform_3(%arg0: i32) -> (i32, i32) {
    %c0_i32 = arith.constant 0 : i32
    %c0_i32_0 = arith.constant 0 : i32
    %c0_i32_1 = arith.constant 0 : i32
    return %c0_i32, %c0_i32_0 : i32, i32
  }
  func.func @transform_4(%arg0: i32) -> (i32, i32) {
    %c0_i32 = arith.constant 0 : i32
    %c0_i32_0 = arith.constant 0 : i32
    %c0_i32_1 = arith.constant 0 : i32
    return %c0_i32, %c0_i32_0 : i32, i32
  }
  func.func @transform_5(%arg0: i32) -> (i32, i32) {
    %c0_i32 = arith.constant 0 : i32
    %c0_i32_0 = arith.constant 0 : i32
    %c0_i32_1 = arith.constant 0 : i32
    return %c0_i32, %c0_i32_0 : i32, i32
  }
  func.func @transform_6(%arg0: i32) -> (i32, i32) {
    %c0_i32 = arith.constant 0 : i32
    %c0_i32_0 = arith.constant 0 : i32
    %c0_i32_1 = arith.constant 0 : i32
    return %c0_i32, %c0_i32_0 : i32, i32
  }
  func.func @transform_7(%arg0: i32) -> (i32, i32) {
    %c0_i32 = arith.constant 0 : i32
    %c0_i32_0 = arith.constant 0 : i32
    return %c0_i32, %arg0 : i32, i32
  }
}

</mosaic_0001>

<bundles_post_ra>
// kernel: tpu_custom_call.1
= control target key start
LH: loop header
LB: loop body
LE: loop exit
PB: predicated region body
PF: predicated region fallthrough
CT: control target
= control target key end

     0   :  { %s3728_s0 = inlined_call_operand.vmem [shape: f32[256,16], index: 0, kind: input, shape index: {}]   ;;  %s3729_s1 = inlined_call_operand.vmem [shape: bf16[256,16], index: 1, kind: input, shape index: {}]   ;;  %s3730_s2 = inlined_call_operand.vmem [shape: f32[256,1], index: 2, kind: input, shape index: {}]   ;;  %s3731_s3 = inlined_call_operand.vmem [shape: bf16[256,256], index: 3, kind: input, shape index: {}]   ;;  %s3732_s4 = inlined_call_operand.vmem [shape: f32[256,1], index: 4, kind: input, shape index: {}]   ;;  %s3733_s5 = inlined_call_operand.vmem [shape: f32[256,1], index: 5, kind: input, shape index: {}]   ;;  %s3734_s6 = inlined_call_operand.<no memory space> [shape: f32[1,1], index: 6, kind: input, shape index: {}]   ;;  %s3735_s7 = inlined_call_operand.hbm [shape: f32[1,256], index: 7, kind: output, shape index: {}]  }
   0x1   :  { %v12_v0 = vstv %s3734_s6 }
   0x2   :  { %13 = vst [vmem:[#allocation2] sm:$0x1] %v12_v0 }
   0x3   :  { %v43_v1 = vld [vmem:[%s3728_s0 + $0x70] sm:$0xff]  ;;  %v44_v2 = vld [vmem:[%s3728_s0 + $0x78] sm:$0xff]  ;;  %vm381_vm0 = vcmask 130048   ;;  %v2241_v6 = vmov 0   ;;  %v41_v9 = vld [vmem:[%s3728_s0 + $0x60] sm:$0xff] }
   0x4   :  { %v59_v3 = vld [vmem:[%s3728_s0 + $0xf0] sm:$0xff]  ;;  %v68_v4 = vpack.c.bf16 %v44_v2, %v43_v1  ;;  %v60_v5 = vld [vmem:[%s3728_s0 + $0xf8] sm:$0xff]  ;;  %2213 = vset.pattern.permute.xlu1 %v2241_v6  ;;  %2212 = vset.pattern.permute.xlu0 %v2241_v6  ;;  %v42_v10 = vld [vmem:[%s3728_s0 + $0x68] sm:$0xff] }
   0x5   :  { %v139_v7 = vld [vmem:[%s3730_s2 + $0xf0] sm:$0xff]  ;;  %v76_v8 = vpack.c.bf16 %v60_v5, %v59_v3  ;;  %2214 = vset.pattern.permute.xlu2 %v2241_v6  ;;  %v57_v12 = vld [vmem:[%s3728_s0 + $0xe0] sm:$0xff]  ;;  %v58_v13 = vld [vmem:[%s3728_s0 + $0xe8] sm:$0xff]  ;;  %v67_v16 = vpack.c.bf16 %v42_v10, %v41_v9 }
   0x6   :  { %293 = vperm.xlu1 %2213, %v139_v7   ;;  %v452_v11 = vsel %vm381_vm0, %v68_v4, 0  ;;  %v123_v14 = vld [vmem:[%s3730_s2 + $0x70] sm:$0xff]  ;;  %v75_v17 = vpack.c.bf16 %v58_v13, %v57_v12  ;;  %v140_v18 = vld [vmem:[%s3730_s2 + $0xf8] sm:$0xff]  ;;  %v121_v21 = vld [vmem:[%s3730_s2 + $0x60] sm:$0xff] }
   0x7   :  { %478 = vmatpush.bf16.xpose.msra.mxu0 %v452_v11  ;;  %v476_v15 = vsel %vm381_vm0, %v76_v8, 0  ;;  %213 = vperm.xlu0 %2212, %v123_v14   ;;  %v449_v19 = vsel %vm381_vm0, %v67_v16, 0  ;;  %v124_v20 = vld [vmem:[%s3730_s2 + $0x78] sm:$0xff]  ;;  %v39_v23 = vld [vmem:[%s3728_s0 + $0x50] sm:$0xff] }
   0x8   :  { %567 = vmatpush.bf16.xpose.msra.mxu1 %v476_v15  ;;  %v473_v22 = vsel %vm381_vm0, %v75_v17, 0  ;;  %v40_v24 = vld [vmem:[%s3728_s0 + $0x58] sm:$0xff]  ;;  %203 = vperm.xlu2 %2214, %v121_v21   ;;  %v55_v25 = vld [vmem:[%s3728_s0 + $0xd0] sm:$0xff] }
   0x9   :  { %v56_v26 = vld [vmem:[%s3728_s0 + $0xd8] sm:$0xff] }
   0xe   :  { %298 = vperm.xlu1 %2213, %v140_v18  }
   0xf   :  { %14 = vsyncpa [#allocation4], 0  ;;  %479 = vmatpush.bf16.xpose.msra.mxu0 %v449_v19  ;;  %218 = vperm.xlu0 %2212, %v124_v20   ;;  %v66_v27 = vpack.c.bf16 %v40_v24, %v39_v23  ;;  %v74_v28 = vpack.c.bf16 %v56_v26, %v55_v25  ;;  %v138_v29 = vld [vmem:[%s3730_s2 + $0xe8] sm:$0xff]  ;;  %v137_v32 = vld [vmem:[%s3730_s2 + $0xe0] sm:$0xff]  ;;  %vm1898_vm1 = vcmask 1040384  }
  0x10   :  { %568 = vmatpush.bf16.xpose.msra.mxu1 %v473_v22  ;;  %v122_v30 = vld [vmem:[%s3730_s2 + $0x68] sm:$0xff]  ;;  %v37_v34 = vld [vmem:[%s3728_s0 + $0x40] sm:$0xff]  ;;  %v135_v40 = vld [vmem:[%s3730_s2 + $0xd0] sm:$0xff] }
  0x11   :  { %v446_v31 = vsel %vm381_vm0, %v66_v27, 0  ;;  %v470_v33 = vsel %vm381_vm0, %v74_v28, 0  ;;  %v38_v35 = vld [vmem:[%s3728_s0 + $0x48] sm:$0xff]  ;;  %208 = vperm.xlu2 %2214, %v122_v30   ;;  %v53_v36 = vld [vmem:[%s3728_s0 + $0xc0] sm:$0xff]  ;;  %v119_v41 = vld [vmem:[%s3730_s2 + $0x50] sm:$0xff] }
  0x12   :  { %v54_v37 = vld [vmem:[%s3728_s0 + $0xc8] sm:$0xff]  ;;  %v65_v38 = vpack.c.bf16 %v38_v35, %v37_v34  ;;  %v120_v43 = vld [vmem:[%s3730_s2 + $0x58] sm:$0xff]  ;;  %v35_v45 = vld [vmem:[%s3728_s0 + $0x30] sm:$0xff] }
  0x13   :  { %v73_v39 = vpack.c.bf16 %v54_v37, %v53_v36  ;;  %v36_v46 = vld [vmem:[%s3728_s0 + $0x38] sm:$0xff]  ;;  %v51_v47 = vld [vmem:[%s3728_s0 + $0xb0] sm:$0xff]  ;;  %v118_v51 = vld [vmem:[%s3730_s2 + $0x48] sm:$0xff] }
  0x14   :  { %v443_v42 = vsel %vm381_vm0, %v65_v38, 0  ;;  %v52_v48 = vld [vmem:[%s3728_s0 + $0xb8] sm:$0xff]  ;;  %v64_v49 = vpack.c.bf16 %v36_v46, %v35_v45  ;;  %v117_v54 = vld [vmem:[%s3730_s2 + $0x40] sm:$0xff]  ;;  %v34_v57 = vld [vmem:[%s3728_s0 + $0x28] sm:$0xff] }
  0x15   :  { %v467_v44 = vsel %vm381_vm0, %v73_v39, 0  ;;  %v72_v50 = vpack.c.bf16 %v52_v48, %v51_v47  ;;  %v136_v52 = vld [vmem:[%s3730_s2 + $0xd8] sm:$0xff]  ;;  %v33_v56 = vld [vmem:[%s3728_s0 + $0x20] sm:$0xff]  ;;  %v50_v59 = vld [vmem:[%s3728_s0 + $0xa8] sm:$0xff] }
  0x16   :  { %288 = vperm.xlu1 %2213, %v138_v29   ;;  %v440_v53 = vsel %vm381_vm0, %v64_v49, 0  ;;  %v49_v58 = vld [vmem:[%s3728_s0 + $0xa0] sm:$0xff]  ;;  %v63_v60 = vpack.c.bf16 %v34_v57, %v33_v56  ;;  %v115_v62 = vld [vmem:[%s3730_s2 + $0x30] sm:$0xff]  ;;  %v134_v1 = vld [vmem:[%s3730_s2 + $0xc8] sm:$0xff] }
  0x17   :  { %480 = vmatpush.bf16.xpose.msra.mxu0 %v446_v31  ;;  %283 = vperm.xlu0 %2212, %v137_v32   ;;  %v464_v55 = vsel %vm381_vm0, %v72_v50, 0  ;;  %v71_v61 = vpack.c.bf16 %v50_v59, %v49_v58  ;;  %v133_v63 = vld [vmem:[%s3730_s2 + $0xc0] sm:$0xff]  ;;  %v31_v3 = vld [vmem:[%s3728_s0 + $0x10] sm:$0xff]  ;;  %v32_v4 = vld [vmem:[%s3728_s0 + $0x18] sm:$0xff] }
  0x18   :  { %569 = vmatpush.bf16.xpose.msra.mxu1 %v470_v33  ;;  %v437_v0 = vsel %vm381_vm0, %v63_v60, 0  ;;  %v47_v5 = vld [vmem:[%s3728_s0 + $0x90] sm:$0xff]  ;;  %v48_v6 = vld [vmem:[%s3728_s0 + $0x98] sm:$0xff]  ;;  %v62_v7 = vpack.c.bf16 %v32_v4, %v31_v3  ;;  %v29_v14 = vld [vmem:[%s3728_s0] sm:$0xff] }
  0x19   :  { %193 = vperm.xlu2 %2214, %v119_v41   ;;  %v461_v2 = vsel %vm381_vm0, %v71_v61, 0  ;;  %v70_v8 = vpack.c.bf16 %v48_v6, %v47_v5  ;;  %v132_v9 = vld [vmem:[%s3730_s2 + $0xb8] sm:$0xff]  ;;  %v131_v12 = vld [vmem:[%s3730_s2 + $0xb0] sm:$0xff]  ;;  %v30_v15 = vld [vmem:[%s3728_s0 + $0x8] sm:$0xff] }
  0x1a   :  { %v116_v10 = vld [vmem:[%s3730_s2 + $0x38] sm:$0xff]  ;;  %v434_v11 = vsel %vm381_vm0, %v62_v7, 0  ;;  %v45_v16 = vld [vmem:[%s3728_s0 + $0x80] sm:$0xff]  ;;  %v46_v17 = vld [vmem:[%s3728_s0 + $0x88] sm:$0xff]  ;;  %v61_v18 = vpack.c.bf16 %v30_v15, %v29_v14 }
  0x1b   :  { %v458_v13 = vsel %vm381_vm0, %v70_v8, 0  ;;  %v69_v19 = vpack.c.bf16 %v46_v17, %v45_v16  ;;  %v129_v20 = vld [vmem:[%s3730_s2 + $0xa0] sm:$0xff]  ;;  %v114_v23 = vld [vmem:[%s3730_s2 + $0x28] sm:$0xff]  ;;  %v112_v26 = vld [vmem:[%s3730_s2 + $0x18] sm:$0xff] }
  0x1c   :  { %v113_v21 = vld [vmem:[%s3730_s2 + $0x20] sm:$0xff]  ;;  %v431_v22 = vsel %vm381_vm0, %v61_v18, 0  ;;  %v130_v27 = vld [vmem:[%s3730_s2 + $0xa8] sm:$0xff]  ;;  %v111_v28 = vld [vmem:[%s3730_s2 + $0x10] sm:$0xff] }
  0x1d   :  { %v455_v24 = vsel %vm381_vm0, %v69_v19, 0  ;;  %v2146_v25 = vld [vmem:[%s3729_s1] sm:$0xff]  ;;  %v127_v30 = vld [vmem:[%s3730_s2 + $0x90] sm:$0xff]  ;;  %v128_v31 = vld [vmem:[%s3730_s2 + $0x98] sm:$0xff] }
  0x1e   :  { %273 = vperm.xlu1 %2213, %v135_v40   ;;  %v109_v29 = vld [vmem:[%s3730_s2] sm:$0xff]  ;;  %v2147_v32 = vld [vmem:[%s3729_s1 + $0x8] sm:$0xff]  ;;  %v786_v36 = vld [vmem:[%s3732_s4 + $0x10] sm:$0xff] }
  0x1f   :  { %481 = vmatpush.bf16.xpose.msra.mxu0 %v443_v42  ;;  %198 = vperm.xlu0 %2212, %v120_v43   ;;  %v126_v33 = vld [vmem:[%s3730_s2 + $0x88] sm:$0xff]  ;;  %v125_v35 = vld [vmem:[%s3730_s2 + $0x80] sm:$0xff]  ;;  %v2148_v38 = vld [vmem:[%s3729_s1 + $0x10] sm:$0xff] }
  0x20   :  { %570 = vmatpush.bf16.xpose.msra.mxu1 %v467_v44  ;;  %v110_v34 = vld [vmem:[%s3730_s2 + $0x8] sm:$0xff]  ;;  %v788_v40 = vld [vmem:[%s3732_s4 + $0x20] sm:$0xff]  ;;  %v791_v43 = vld [vmem:[%s3732_s4 + $0x38] sm:$0xff] }
  0x21   :  { %278 = vperm.xlu2 %2214, %v136_v52   ;;  %v785_v37 = vld [vmem:[%s3732_s4 + $0x8] sm:$0xff]  ;;  %v784_v41 = vld [vmem:[%s3732_s4] sm:$0xff]  ;;  %v787_v45 = vld [vmem:[%s3732_s4 + $0x18] sm:$0xff] }
  0x22   :  { %v789_v39 = vld [vmem:[%s3732_s4 + $0x28] sm:$0xff]  ;;  %v792_v42 = vld [vmem:[%s3732_s4 + $0x40] sm:$0xff]  ;;  %v2149_v46 = vld [vmem:[%s3729_s1 + $0x18] sm:$0xff] }
  0x23   :  { %v795_v47 = vld [vmem:[%s3732_s4 + $0x58] sm:$0xff]  ;;  %v794_v48 = vld [vmem:[%s3732_s4 + $0x50] sm:$0xff]  ;;  %v2150_v56 = vld [vmem:[%s3729_s1 + $0x20] sm:$0xff] }
  0x24   :  { %v790_v50 = vld [vmem:[%s3732_s4 + $0x30] sm:$0xff]  ;;  %v801_v57 = vld [vmem:[%s3732_s4 + $0x88] sm:$0xff]  ;;  %v800_v59 = vld [vmem:[%s3732_s4 + $0x80] sm:$0xff] }
  0x25   :  { %v798_v52 = vld [vmem:[%s3732_s4 + $0x70] sm:$0xff]  ;;  %v796_v61 = vld [vmem:[%s3732_s4 + $0x60] sm:$0xff]  ;;  %v799_v3 = vld [vmem:[%s3732_s4 + $0x78] sm:$0xff] }
  0x26   :  { %188 = vperm.xlu1 %2213, %v118_v51   ;;  %v2151_v4 = vld [vmem:[%s3729_s1 + $0x28] sm:$0xff]  ;;  %v807_v5 = vld [vmem:[%s3732_s4 + $0xb8] sm:$0xff]  ;;  %v806_v7 = vld [vmem:[%s3732_s4 + $0xb0] sm:$0xff] }
  0x27   :  { %482 = vmatpush.bf16.xpose.msra.mxu0 %v440_v53  ;;  %183 = vperm.xlu0 %2212, %v117_v54   ;;  %v797_v53 = vld [vmem:[%s3732_s4 + $0x68] sm:$0xff]  ;;  %v2152_v17 = vld [vmem:[%s3729_s1 + $0x30] sm:$0xff]  ;;  %v812_v19 = vld [vmem:[%s3732_s4 + $0xe0] sm:$0xff] }
  0x28   :  { %571 = vmatpush.bf16.xpose.msra.mxu1 %v464_v55  ;;  %v793_v55 = vld [vmem:[%s3732_s4 + $0x48] sm:$0xff] }
  0x29   :  { %263 = vperm.xlu2 %2214, %v133_v63   ;;  %v804_v63 = vld [vmem:[%s3732_s4 + $0xa0] sm:$0xff]  ;;  %v805_v14 = vld [vmem:[%s3732_s4 + $0xa8] sm:$0xff] }
  0x2a   :  { %v813_v18 = vld [vmem:[%s3732_s4 + $0xe8] sm:$0xff] }
  0x2e   :  { %173 = vperm.xlu1 %2213, %v115_v62  }
  0x2f   :  { %483 = vmatpush.bf16.xpose.msra.mxu0 %v437_v0  ;;  %268 = vperm.xlu0 %2212, %v134_v1   ;;  %v803_v0 = vld [vmem:[%s3732_s4 + $0x98] sm:$0xff] }
  0x30   :  { %572 = vmatpush.bf16.xpose.msra.mxu1 %v461_v2 }
  0x31   :  { %178 = vperm.xlu2 %2214, %v116_v10   ;;  %v802_v10 = vld [vmem:[%s3732_s4 + $0x90] sm:$0xff] }
  0x36   :  { %258 = vperm.xlu1 %2213, %v132_v9  }
  0x37   :  { %484 = vmatpush.bf16.xpose.msra.mxu0 %v434_v11  ;;  %253 = vperm.xlu0 %2212, %v131_v12   ;;  %v810_v11 = vld [vmem:[%s3732_s4 + $0xd0] sm:$0xff]  ;;  %v809_v12 = vld [vmem:[%s3732_s4 + $0xc8] sm:$0xff] }
  0x38   :  { %573 = vmatpush.bf16.xpose.msra.mxu1 %v458_v13 }
  0x39   :  { %163 = vperm.xlu2 %2214, %v113_v21   ;;  %v808_v21 = vld [vmem:[%s3732_s4 + $0xc0] sm:$0xff] }
  0x3e   :  { %243 = vperm.xlu1 %2213, %v129_v20  }
  0x3f   :  { %485 = vmatpush.bf16.xpose.msra.mxu0 %v431_v22  ;;  %168 = vperm.xlu0 %2212, %v114_v23   ;;  %v1556_v23 = vld [vmem:[%s3733_s5] sm:$0xff] }
  0x40   :  { %574 = vmatpush.bf16.xpose.msra.mxu1 %v455_v24 }
  0x41   :  { %248 = vperm.xlu2 %2214, %v130_v27  }
  0x46   :  { %158 = vperm.xlu1 %2213, %v112_v26   ;;  %1986 = vmatmul.msk.bf16.vlgmr.msra.gmra.mxu0 %vm381_vm0, %v2146_v25  ;;  %v811_v26 = vld [vmem:[%s3732_s4 + $0xd8] sm:$0xff] }
  0x47   :  { %2002 = vmatmul.msk.bf16.vlgmr.msra.gmra.mxu1 %vm381_vm0, %v2146_v25  ;;  %153 = vperm.xlu0 %2212, %v111_v28   ;;  %v815_v25 = vld [vmem:[%s3732_s4 + $0xf8] sm:$0xff] }
  0x48   :  { %v2153_v28 = vld [vmem:[%s3729_s1 + $0x38] sm:$0xff] }
  0x49   :  { %233 = vperm.xlu2 %2214, %v127_v30  }
  0x4e   :  { %143 = vperm.xlu1 %2213, %v109_v29   ;;  %v1559_v29 = vld [vmem:[%s3733_s5 + $0x18] sm:$0xff] }
  0x4f   :  { %238 = vperm.xlu0 %2212, %v128_v31   ;;  %v1558_v31 = vld [vmem:[%s3733_s5 + $0x10] sm:$0xff] }
  0x51   :  { %148 = vperm.xlu2 %2214, %v110_v34   ;;  %v1562_v34 = vld [vmem:[%s3733_s5 + $0x30] sm:$0xff] }
  0x56   :  { %228 = vperm.xlu1 %2213, %v126_v33   ;;  %1987 = vmatmul.msk.bf16.gmra.mxu0 %vm381_vm0, %v2147_v32  ;;  %v814_v33 = vld [vmem:[%s3732_s4 + $0xf0] sm:$0xff]  ;;  %s1913_s4 = sshll.u32 %s3735_s7, 4  ;;  %s1914_s4 = int_to_ptr.hbm [resolvable:$true] %s1913_s4 }
  0x57   :  { %2003 = vmatmul.msk.bf16.gmra.mxu1 %vm381_vm0, %v2147_v32  ;;  %223 = vperm.xlu0 %2212, %v125_v35  }
  0x59   :  { %818 = vperm.xlu2 %2214, %v784_v41   ;;  %v1565_v41 = vld [vmem:[%s3733_s5 + $0x48] sm:$0xff] }
  0x5e   :  { %828 = vperm.xlu1 %2213, %v786_v36   ;;  %v1561_v36 = vld [vmem:[%s3733_s5 + $0x28] sm:$0xff] }
  0x5f   :  { %823 = vperm.xlu0 %2212, %v785_v37  }
  0x61   :  { %833 = vperm.xlu2 %2214, %v787_v45   ;;  %v1564_v45 = vld [vmem:[%s3733_s5 + $0x40] sm:$0xff] }
  0x62   :  { %v2530_v44 = vpop.permute.xlu2 %203 }
  0x66   :  { %843 = vperm.xlu1 %2213, %v789_v39   ;;  %1988 = vmatmul.msk.bf16.gmra.mxu0 %vm381_vm0, %v2148_v38  ;;  %v1557_v39 = vld [vmem:[%s3733_s5 + $0x8] sm:$0xff] }
  0x67   :  { %2004 = vmatmul.msk.bf16.gmra.mxu1 %vm381_vm0, %v2148_v38  ;;  %838 = vperm.xlu0 %2212, %v788_v40   ;;  %v2154_v40 = vld [vmem:[%s3729_s1 + $0x40] sm:$0xff] }
  0x69   :  { %848 = vperm.xlu2 %2214, %v790_v50  }
  0x6b   :  { %v2551_v51 = vpop.permute.xlu2 %208 }
  0x6e   :  { %858 = vperm.xlu1 %2213, %v792_v42  }
  0x6f   :  { %853 = vperm.xlu0 %2212, %v791_v43  }
  0x71   :  { %863 = vperm.xlu2 %2214, %v793_v55  }
  0x73   :  { %v2570_v58 = vpop.permute.xlu2 %193 }
  0x76   :  { %873 = vperm.xlu1 %2213, %v795_v47   ;;  %1989 = vmatmul.msk.bf16.gmra.mxu0 %vm381_vm0, %v2149_v46 }
  0x77   :  { %2005 = vmatmul.msk.bf16.gmra.mxu1 %vm381_vm0, %v2149_v46  ;;  %868 = vperm.xlu0 %2212, %v794_v48   ;;  %v1560_v48 = vld [vmem:[%s3733_s5 + $0x20] sm:$0xff] }
  0x78   :  { %v2546_v49 = vpop.permute.xlu1 %293 }
  0x79   :  { %878 = vperm.xlu2 %2214, %v796_v61   ;;  %v2582_v62 = vpop.permute.xlu0 %213 }
  0x7b   :  { %v2590_v1 = vpop.permute.xlu2 %278 }
  0x7e   :  { %888 = vperm.xlu1 %2213, %v798_v52  }
  0x7f   :  { %883 = vperm.xlu0 %2212, %v797_v53   ;;  %v1568_v53 = vld [vmem:[%s3733_s5 + $0x60] sm:$0xff] }
  0x80   :  { %v2559_v54 = vpop.permute.xlu1 %298 }
  0x81   :  { %893 = vperm.xlu2 %2214, %v799_v3   ;;  %v2603_v6 = vpop.permute.xlu0 %218  ;;  %v1563_v3 = vld [vmem:[%s3733_s5 + $0x38] sm:$0xff] }
  0x83   :  { %v2612_v9 = vpop.permute.xlu2 %263 }
  0x86   :  { %903 = vperm.xlu1 %2213, %v801_v57   ;;  %1990 = vmatmul.msk.bf16.gmra.mxu0 %vm381_vm0, %v2150_v56 }
  0x87   :  { %2006 = vmatmul.msk.bf16.gmra.mxu1 %vm381_vm0, %v2150_v56  ;;  %898 = vperm.xlu0 %2212, %v800_v59   ;;  %v1567_v59 = vld [vmem:[%s3733_s5 + $0x58] sm:$0xff] }
  0x88   :  { %v2577_v60 = vpop.permute.xlu1 %288 }
  0x89   :  { %908 = vperm.xlu2 %2214, %v802_v10   ;;  %v2623_v13 = vpop.permute.xlu0 %283 }
  0x8b   :  { %v2630_v16 = vpop.permute.xlu2 %178 }
  0x8e   :  { %918 = vperm.xlu1 %2213, %v804_v63  }
  0x8f   :  { %913 = vperm.xlu0 %2212, %v803_v0  }
  0x90   :  { %v2592_v2 = vpop.permute.xlu1 %273 }
  0x91   :  { %923 = vperm.xlu2 %2214, %v805_v14   ;;  %v2642_v20 = vpop.permute.xlu0 %198  ;;  %v1566_v14 = vld [vmem:[%s3733_s5 + $0x50] sm:$0xff] }
  0x93   :  { %v2653_v24 = vpop.permute.xlu2 %163 }
  0x96   :  { %933 = vperm.xlu1 %2213, %v807_v5   ;;  %1991 = vmatmul.msk.bf16.gmra.mxu0 %vm381_vm0, %v2151_v4  ;;  %v2155_v5 = vld [vmem:[%s3729_s1 + $0x48] sm:$0xff] }
  0x97   :  { %2007 = vmatmul.msk.bf16.gmra.mxu1 %vm381_vm0, %v2151_v4  ;;  %928 = vperm.xlu0 %2212, %v806_v7   ;;  %v1571_v7 = vld [vmem:[%s3733_s5 + $0x78] sm:$0xff] }
  0x98   :  { %v2610_v8 = vpop.permute.xlu1 %188 }
  0x99   :  { %938 = vperm.xlu2 %2214, %v808_v21   ;;  %v2661_v27 = vpop.permute.xlu0 %183 }
  0x9b   :  { %v2674_v32 = vpop.permute.xlu2 %248 }
  0x9e   :  { %948 = vperm.xlu1 %2213, %v810_v11  }
  0x9f   :  { %943 = vperm.xlu0 %2212, %v809_v12   ;;  %v1570_v12 = vld [vmem:[%s3733_s5 + $0x70] sm:$0xff] }
  0xa0   :  { %v2628_v15 = vpop.permute.xlu1 %173 }
  0xa1   :  { %953 = vperm.xlu2 %2214, %v811_v26   ;;  %v2684_v35 = vpop.permute.xlu0 %268  ;;  %v1573_v26 = vld [vmem:[%s3733_s5 + $0x88] sm:$0xff] }
  0xa3   :  { %v2691_v38 = vpop.permute.xlu2 %233 }
  0xa4   :  { %3783 = vst [vmem:[#allocation7_spill] sm:$0xff] %v2691_v38 }
  0xa6   :  { %963 = vperm.xlu1 %2213, %v813_v18   ;;  %1992 = vmatmul.msk.bf16.gmra.mxu0 %vm381_vm0, %v2152_v17 }
  0xa7   :  { %2008 = vmatmul.msk.bf16.gmra.mxu1 %vm381_vm0, %v2152_v17  ;;  %958 = vperm.xlu0 %2212, %v812_v19   ;;  %v1574_v19 = vld [vmem:[%s3733_s5 + $0x90] sm:$0xff] }
  0xa8   :  { %v2648_v22 = vpop.permute.xlu1 %258 }
  0xa9   :  { %968 = vperm.xlu2 %2214, %v814_v33   ;;  %v2707_v46 = vpop.permute.xlu0 %253 }
  0xab   :  { %v2716_v50 = vpop.permute.xlu2 %148 }
  0xae   :  { %1590 = vperm.xlu1 %2213, %v1556_v23  }
  0xaf   :  { %973 = vperm.xlu0 %2212, %v815_v25  }
  0xb0   :  { %v2669_v30 = vpop.permute.xlu1 %243 }
  0xb1   :  { %3782 = vst [vmem:[#allocation6_spill] sm:$0xff] %v2669_v30  ;;  %1595 = vperm.xlu2 %2214, %v1557_v39   ;;  %v2728_v0 = vpop.permute.xlu0 %168 }
  0xb6   :  { %1605 = vperm.xlu1 %2213, %v1559_v29   ;;  %1993 = vmatmul.msk.bf16.gmra.mxu0 %vm381_vm0, %v2153_v28 }
  0xb7   :  { %2009 = vmatmul.msk.bf16.gmra.mxu1 %vm381_vm0, %v2153_v28  ;;  %1600 = vperm.xlu0 %2212, %v1558_v31   ;;  %v1569_v31 = vld [vmem:[%s3733_s5 + $0x68] sm:$0xff] }
  0xb8   :  { %v2689_v37 = vpop.permute.xlu1 %158 }
  0xb9   :  { %1610 = vperm.xlu2 %2214, %v1560_v48   ;;  %v2751_v17 = vpop.permute.xlu0 %153  ;;  %v1580_v48 = vld [vmem:[%s3733_s5 + $0xc0] sm:$0xff] }
  0xbe   :  { %1620 = vperm.xlu1 %2213, %v1562_v34   ;;  %v2156_v34 = vld [vmem:[%s3729_s1 + $0x50] sm:$0xff] }
  0xbf   :  { %1615 = vperm.xlu0 %2212, %v1561_v36   ;;  %v1577_v36 = vld [vmem:[%s3733_s5 + $0xa8] sm:$0xff] }
  0xc0   :  { %v2710_v47 = vpop.permute.xlu1 %143 }
  0xc1   :  { %1625 = vperm.xlu2 %2214, %v1563_v3  }
  0xc3   :  { %v487_v42 = vpop.f32.mrf.mxu0 }
  0xc4   :  { %v2702_v43 = vpop.f32.mrf.mxu1  ;;  %v488_v52 = vadd.f32 %v487_v42, %v2710_v47  ;;  %v1572_v42 = vld [vmem:[%s3733_s5 + $0x80] sm:$0xff] }
  0xc6   :  { %1635 = vperm.xlu1 %2213, %v1565_v41   ;;  %1994 = vmatmul.msk.bf16.gmra.mxu0 %vm381_vm0, %v2154_v40  ;;  %v656_v61 = vmax.f32 %v488_v52, 0.0  ;;  %v1576_v41 = vld [vmem:[%s3733_s5 + $0xa0] sm:$0xff] }
  0xc7   :  { %2010 = vmatmul.msk.bf16.gmra.mxu1 %vm381_vm0, %v2154_v40  ;;  %1630 = vperm.xlu0 %2212, %v1564_v45  }
  0xc9   :  { %1640 = vperm.xlu2 %2214, %v1566_v14   ;;  %v1582_v14 = vld [vmem:[%s3733_s5 + $0xd0] sm:$0xff] }
  0xcb   :  { %v489_v55 = vpop.f32.mrf.mxu0 }
  0xcc   :  { %v490_v56 = vadd.f32 %v489_v55, %v2716_v50  ;;  %v2723_v57 = vpop.f32.mrf.mxu1 }
  0xce   :  { %1650 = vperm.xlu1 %2213, %v1568_v53   ;;  %v658_v63 = vmax.f32 %v490_v56, 0.0  ;;  %v1579_v56 = vld [vmem:[%s3733_s5 + $0xb8] sm:$0xff] }
  0xcf   :  { %1645 = vperm.xlu0 %2212, %v1567_v59  }
  0xd0   :  { %v2733_v4 = vpack.c.bf16 %v658_v63, %v656_v61  ;;  %v1575_v63 = vld [vmem:[%s3733_s5 + $0x98] sm:$0xff] }
  0xd1   :  { %1655 = vperm.xlu2 %2214, %v1569_v31  }
  0xd3   :  { %v492_v10 = vpop.f32.mrf.mxu0 }
  0xd4   :  { %v2741_v11 = vpop.f32.mrf.mxu1  ;;  %v493_v18 = vadd.f32 %v492_v10, %v2751_v17 }
  0xd6   :  { %1665 = vperm.xlu1 %2213, %v1571_v7   ;;  %1995 = vmatmul.msk.bf16.gmra.mxu0 %vm381_vm0, %v2155_v5  ;;  %v660_v28 = vmax.f32 %v493_v18, 0.0  ;;  %v1583_v7 = vld [vmem:[%s3733_s5 + $0xd8] sm:$0xff]  ;;  %v1578_v18 = vld [vmem:[%s3733_s5 + $0xb0] sm:$0xff] }
  0xd7   :  { %2011 = vmatmul.msk.bf16.gmra.mxu1 %vm381_vm0, %v2155_v5  ;;  %1660 = vperm.xlu0 %2212, %v1570_v12   ;;  %v2157_v5 = vld [vmem:[%s3729_s1 + $0x58] sm:$0xff] }
  0xd9   :  { %1670 = vperm.xlu2 %2214, %v1572_v42  }
  0xdb   :  { %v494_v21 = vpop.f32.mrf.mxu0 }
  0xdc   :  { %v495_v23 = vadd.f32 %v494_v21, %v2689_v37  ;;  %v2758_v25 = vpop.f32.mrf.mxu1  ;;  %v1586_v21 = vld [vmem:[%s3733_s5 + $0xf0] sm:$0xff] }
  0xde   :  { %1680 = vperm.xlu1 %2213, %v1574_v19   ;;  %v662_v29 = vmax.f32 %v495_v23, 0.0 }
  0xdf   :  { %1675 = vperm.xlu0 %2212, %v1573_v26  }
  0xe0   :  { %v2766_v33 = vpack.c.bf16 %v662_v29, %v660_v28  ;;  %v1585_v29 = vld [vmem:[%s3733_s5 + $0xe8] sm:$0xff] }
  0xe1   :  { %1685 = vperm.xlu2 %2214, %v1575_v63  }
  0xe3   :  { %v497_v39 = vpop.f32.mrf.mxu0 }
  0xe4   :  { %v2774_v40 = vpop.f32.mrf.mxu1  ;;  %v498_v45 = vadd.f32 %v497_v39, %v2653_v24 }
  0xe6   :  { %1695 = vperm.xlu1 %2213, %v1577_v36   ;;  %1996 = vmatmul.msk.bf16.gmra.mxu0 %vm381_vm0, %v2156_v34  ;;  %v664_v59 = vmax.f32 %v498_v45, 0.0  ;;  %v1581_v36 = vld [vmem:[%s3733_s5 + $0xc8] sm:$0xff] }
  0xe7   :  { %2012 = vmatmul.msk.bf16.gmra.mxu1 %vm381_vm0, %v2156_v34  ;;  %1690 = vperm.xlu0 %2212, %v1576_v41   ;;  %v2158_v41 = vld [vmem:[%s3729_s1 + $0x60] sm:$0xff] }
  0xe9   :  { %1700 = vperm.xlu2 %2214, %v1578_v18  }
  0xeb   :  { %v499_v52 = vpop.f32.mrf.mxu0 }
  0xec   :  { %v500_v53 = vadd.f32 %v499_v52, %v2728_v0  ;;  %v2789_v55 = vpop.f32.mrf.mxu1  ;;  %v1584_v52 = vld [vmem:[%s3733_s5 + $0xe0] sm:$0xff] }
  0xee   :  { %1710 = vperm.xlu1 %2213, %v1580_v48   ;;  %v666_v61 = vmax.f32 %v500_v53, 0.0  ;;  %v1886_v48 = vld [vmem:[#allocation2] sm:$0x1] }
  0xef   :  { %1705 = vperm.xlu0 %2212, %v1579_v56  }
  0xf0   :  { %v2797_v3 = vpack.c.bf16 %v666_v61, %v664_v59  ;;  %v1587_v59 = vld [vmem:[%s3733_s5 + $0xf8] sm:$0xff]  ;;  %v2159_v61 = vld [vmem:[%s3729_s1 + $0x68] sm:$0xff] }
  0xf1   :  { %1715 = vperm.xlu2 %2214, %v1581_v36  }
  0xf3   :  { %v502_v10 = vpop.f32.mrf.mxu0 }
  0xf4   :  { %v2805_v12 = vpop.f32.mrf.mxu1  ;;  %v503_v19 = vadd.f32 %v502_v10, %v2628_v15 }
  0xf6   :  { %1725 = vperm.xlu1 %2213, %v1583_v7   ;;  %1997 = vmatmul.msk.bf16.gmra.mxu0 %vm381_vm0, %v2157_v5  ;;  %v668_v31 = vmax.f32 %v503_v19, 0.0 }
  0xf7   :  { %2013 = vmatmul.msk.bf16.gmra.mxu1 %vm381_vm0, %v2157_v5  ;;  %1720 = vperm.xlu0 %2212, %v1582_v14   ;;  %v2160_v14 = vld [vmem:[%s3729_s1 + $0x70] sm:$0xff] }
  0xf9   :  { %1730 = vperm.xlu2 %2214, %v1584_v52  }
  0xfb   :  { %v504_v23 = vpop.f32.mrf.mxu0 }
  0xfc   :  { %v505_v26 = vadd.f32 %v504_v23, %v2630_v16  ;;  %v2820_v28 = vpop.f32.mrf.mxu1 }
  0xfe   :  { %1740 = vperm.xlu1 %2213, %v1586_v21   ;;  %v670_v34 = vmax.f32 %v505_v26, 0.0  ;;  %v577_v26 = vadd.f32 %v2702_v43, %v2710_v47 }
  0xff   :  { %1735 = vperm.xlu0 %2212, %v1585_v29   ;;  %v579_v29 = vadd.f32 %v2723_v57, %v2716_v50 }
 0x100   :  { %v2828_v39 = vpack.c.bf16 %v670_v34, %v668_v31  ;;  %v2161_v31 = vld [vmem:[%s3729_s1 + $0x78] sm:$0xff] }
 0x101   :  { %1745 = vperm.xlu2 %2214, %v1587_v59  }
 0x103   :  { %v507_v42 = vpop.f32.mrf.mxu0 }
 0x104   :  { %v2833_v45 = vpop.f32.mrf.mxu1 }
 0x106   :  { %1998 = vmatmul.msk.bf16.gmra.mxu0 %vm381_vm0, %v2158_v41 }
 0x107   :  { %2014 = vmatmul.msk.bf16.gmra.mxu1 %vm381_vm0, %v2158_v41  ;;  %1889 = vperm.xlu0 %2212, %v1886_v48   ;;  %v657_v41 = vmax.f32 %v577_v26, 0.0  ;;  %v659_v48 = vmax.f32 %v579_v29, 0.0 }
 0x109   :  { %v2872_v52 = vpack.c.bf16 %v659_v48, %v657_v41 }
 0x10b   :  { %v509_v53 = vpop.f32.mrf.mxu0 }
 0x10c   :  { %v2840_v56 = vpop.f32.mrf.mxu1 }
 0x113   :  { %v512_v63 = vpop.f32.mrf.mxu0 }
 0x114   :  { %v2848_v5 = vpop.f32.mrf.mxu1  ;;  %v513_v41 = vadd.f32 %v512_v63, %v2570_v58 }
 0x116   :  { %1999 = vmatmul.msk.bf16.gmra.mxu0 %vm381_vm0, %v2159_v61 }
 0x117   :  { %2015 = vmatmul.msk.bf16.gmra.mxu1 %vm381_vm0, %v2159_v61 }
 0x11b   :  { %v514_v7 = vpop.f32.mrf.mxu0 }
 0x11c   :  { %v2852_v10 = vpop.f32.mrf.mxu1  ;;  %v515_v26 = vadd.f32 %v514_v7, %v2642_v20 }
 0x123   :  { %v517_v18 = vpop.f32.mrf.mxu0 }
 0x124   :  { %v2857_v19 = vpop.f32.mrf.mxu1  ;;  %v518_v61 = vadd.f32 %v517_v18, %v2530_v44  ;;  %v510_v18 = vadd.f32 %v509_v53, %v2610_v8  ;;  %v587_v53 = vadd.f32 %v2774_v40, %v2653_v24 }
 0x126   :  { %2000 = vmatmul.msk.bf16.gmra.mxu0 %vm381_vm0, %v2160_v14 }
 0x127   :  { %2016 = vmatmul.msk.bf16.gmra.mxu1 %vm381_vm0, %v2160_v14 }
 0x12b   :  { %v519_v21 = vpop.f32.mrf.mxu0 }
 0x12c   :  { %v2861_v23 = vpop.f32.mrf.mxu1  ;;  %v520_v47 = vadd.f32 %v519_v21, %v2551_v51  ;;  %v680_v21 = vmax.f32 %v518_v61, 0.0  ;;  %v589_v61 = vadd.f32 %v2789_v55, %v2728_v0 }
 0x12e   :  { %v682_v29 = vmax.f32 %v520_v47, 0.0 }
 0x130   :  { %v764_v7 = vpack.c.bf16 %v682_v29, %v680_v21  ;;  %v667_v29 = vmax.f32 %v589_v61, 0.0  ;;  %v609_v21 = vadd.f32 %v2861_v23, %v2551_v51  ;;  %v2076_v51 = vld [vmem:[%s3731_s3 + $0x70] sm:$0xf] }
 0x133   :  { %v522_v34 = vpop.f32.mrf.mxu0 }
 0x134   :  { %v611_v36 = vpop.f32.mrf.mxu1  ;;  %v523_v59 = vadd.f32 %v522_v34, %v2582_v62  ;;  %v584_v34 = vadd.f32 %v2758_v25, %v2689_v37  ;;  %v594_v37 = vadd.f32 %v2820_v28, %v2630_v16  ;;  %v676_v25 = vmax.f32 %v513_v41, 0.0 }
 0x135   :  { %v612_v40 = vadd.f32 %v611_v36, %v2582_v62  ;;  %v607_v41 = vadd.f32 %v2857_v19, %v2530_v44  ;;  %v2020_v62 = vld [vmem:[%s3731_s3] sm:$0xf]  ;;  %v2163_v44 = vld [vmem:[%s3731_s3 + $0x4] sm:$0xf0]  ;;  %v604_v19 = vadd.f32 %v2852_v10, %v2642_v20  ;;  %v599_v20 = vadd.f32 %v2840_v56, %v2610_v8  ;;  %v2028_v8 = vld [vmem:[%s3731_s3 + $0x10] sm:$0xf] }
 0x136   :  { %2001 = vmatmul.msk.bf16.gmra.mxu0 %vm381_vm0, %v2161_v31  ;;  %v684_v14 = vmax.f32 %v523_v59, 0.0  ;;  %v678_v59 = vmax.f32 %v515_v26, 0.0  ;;  %v663_v47 = vmax.f32 %v584_v34, 0.0  ;;  %v665_v26 = vmax.f32 %v587_v53, 0.0  ;;  %v2165_v56 = vld [vmem:[%s3731_s3 + $0x14] sm:$0xf0] }
 0x137   :  { %2017 = vmatmul.msk.bf16.gmra.mxu1 %vm381_vm0, %v2161_v31  ;;  %v582_v31 = vadd.f32 %v2741_v11, %v2751_v17  ;;  %v592_v11 = vadd.f32 %v2805_v12, %v2628_v15  ;;  %v508_v17 = vadd.f32 %v507_v42, %v2661_v27  ;;  %v671_v15 = vmax.f32 %v594_v37, 0.0 }
 0x138   :  { %v762_v63 = vpack.c.bf16 %v678_v59, %v676_v25  ;;  %v757_v0 = vpack.c.bf16 %v667_v29, %v665_v26  ;;  %v675_v37 = vmax.f32 %v599_v20, 0.0  ;;  %v2084_v25 = vld [vmem:[%s3731_s3 + $0x80] sm:$0xf]  ;;  %v2972_v61 = vor.u32 %v2165_v56, %v2028_v8 }
 0x139   :  { %v672_v12 = vmax.f32 %v508_v17, 0.0  ;;  %v2036_v26 = vld [vmem:[%s3731_s3 + $0x20] sm:$0xf] }
 0x13b   :  { %v524_v43 = vpop.f32.mrf.mxu0 }
 0x13c   :  { %v525_v50 = vadd.f32 %v524_v43, %v2603_v6  ;;  %v613_v57 = vpop.f32.mrf.mxu1 }
 0x13d   :  { %v614_v55 = vadd.f32 %v613_v57, %v2603_v6  ;;  %v602_v6 = vadd.f32 %v2848_v5, %v2570_v58  ;;  %v681_v58 = vmax.f32 %v607_v41, 0.0  ;;  %v683_v5 = vmax.f32 %v609_v21, 0.0 }
 0x13e   :  { %v686_v38 = vmax.f32 %v525_v50, 0.0  ;;  %v2940_v57 = vor.u32 %v2163_v44, %v2020_v62 }
 0x13f   :  { %v677_v10 = vmax.f32 %v602_v6, 0.0 }
 0x140   :  { %v766_v30 = vpack.c.bf16 %v686_v38, %v684_v14  ;;  %v661_v38 = vmax.f32 %v582_v31, 0.0  ;;  %v669_v14 = vmax.f32 %v592_v11, 0.0 }
 0x142   :  { %1136 = vmatpush.bf16.msrb.mxu0 %v766_v30  ;;  %2194 = vmatpush.bf16.msra.mxu2 %v766_v30  ;;  %v674_v30 = vmax.f32 %v510_v18, 0.0  ;;  %v2896_v50 = vpack.c.bf16 %v663_v47, %v661_v38  ;;  %v759_v24 = vpack.c.bf16 %v671_v15, %v669_v14  ;;  %v687_v18 = vmax.f32 %v614_v55, 0.0 }
 0x143   :  { %v2884_v48 = vpop.f32.mrf.mxu0  ;;  %v679_v38 = vmax.f32 %v604_v19, 0.0  ;;  %v765_v47 = vpack.c.bf16 %v683_v5, %v681_v58  ;;  %v2169_v19 = vld [vmem:[%s3731_s3 + $0x34] sm:$0xf0]  ;;  %v2100_v58 = vld [vmem:[%s3731_s3 + $0xa0] sm:$0xf] }
 0x144   :  { %v2887_v43 = vpop.f32.mrf.mxu1  ;;  %v760_v42 = vpack.c.bf16 %v674_v30, %v672_v12  ;;  %v2179_v30 = vld [vmem:[%s3731_s3 + $0x84] sm:$0xf0] }
 0x145   :  { %v2974_v14 = vor.u32 %v2179_v30, %v2084_v25  ;;  %v2183_v5 = vld [vmem:[%s3731_s3 + $0xa4] sm:$0xf0] }
 0x146   :  { %1137 = vmatpush.bf16.msrb.mxu0 %v764_v7  ;;  %2195 = vmatpush.bf16.msra.mxu2 %v764_v7  ;;  %v597_v7 = vadd.f32 %v2833_v45, %v2661_v27  ;;  %v763_v27 = vpack.c.bf16 %v679_v38, %v677_v10  ;;  %v3022_v10 = vor.u32 %v2183_v5, %v2100_v58 }
 0x148   :  { %v673_v11 = vmax.f32 %v597_v7, 0.0 }
 0x14a   :  { %1138 = vmatpush.bf16.msrb.mxu0 %v762_v63  ;;  %2196 = vmatpush.bf16.msra.mxu2 %v762_v63 }
 0x14b   :  { %v2900_v16 = vpop.f32.mrf.mxu0 }
 0x14c   :  { %v2902_v28 = vpop.f32.mrf.mxu1 }
 0x14e   :  { %1139 = vmatpush.bf16.msrb.mxu0 %v760_v42  ;;  %2197 = vmatpush.bf16.msra.mxu2 %v760_v42 }
 0x152   :  { %1140 = vmatpush.bf16.msrb.mxu0 %v2828_v39  ;;  %2198 = vmatpush.bf16.msra.mxu2 %v2828_v39  ;;  %v685_v39 = vmax.f32 %v612_v40, 0.0  ;;  %v2092_v40 = vld [vmem:[%s3731_s3 + $0x90] sm:$0xf] }
 0x153   :  { %v2908_v31 = vpop.f32.mrf.mxu0 }
 0x154   :  { %v2910_v34 = vpop.f32.mrf.mxu1 }
 0x156   :  { %1141 = vmatpush.bf16.msrb.mxu0 %v2797_v3  ;;  %2199 = vmatpush.bf16.msra.mxu2 %v2797_v3  ;;  %v2177_v3 = vld [vmem:[%s3731_s3 + $0x74] sm:$0xf0] }
 0x157   :  { %v2942_v59 = vor.u32 %v2177_v3, %v2076_v51 }
 0x15a   :  { %1142 = vmatpush.bf16.msrb.mxu0 %v2766_v33  ;;  %2200 = vmatpush.bf16.msra.mxu2 %v2766_v33  ;;  %v767_v33 = vpack.c.bf16 %v687_v18, %v685_v39 }
 0x15b   :  { %v2936_v23 = vpop.f32.mrf.mxu0 }
 0x15c   :  { %v2938_v36 = vpop.f32.mrf.mxu1 }
 0x15e   :  { %1143 = vmatpush.bf16.msrb.mxu0 %v2733_v4  ;;  %2201 = vmatpush.bf16.msra.mxu2 %v2733_v4  ;;  %v761_v4 = vpack.c.bf16 %v675_v37, %v673_v11  ;;  %v2052_v11 = vld [vmem:[%s3731_s3 + $0x40] sm:$0xf]  ;;  %v2171_v37 = vld [vmem:[%s3731_s3 + $0x44] sm:$0xf0] }
 0x15f   :  { %v3040_v56 = vor.u32 %v2171_v37, %v2052_v11 }
 0x161   :  { %1144 = vmatmul.bf16.vlgmr.msrb.gmra.mxu0 %v2940_v57  ;;  %1179 = vmatmul.bf16.vlgmr.msra.gmra.mxu2 %v2942_v59 }
 0x162   :  { %1314 = vmatpush.bf16.msrb.mxu2 %v767_v33 }
 0x163   :  { %v2952_v17 = vpop.f32.mrf.mxu0 }
 0x164   :  { %v2954_v45 = vpop.f32.mrf.mxu1 }
 0x166   :  { %1315 = vmatpush.bf16.msrb.mxu2 %v765_v47 }
 0x16a   :  { %1316 = vmatpush.bf16.msrb.mxu2 %v763_v27  ;;  %v2108_v27 = vld [vmem:[%s3731_s3 + $0xb0] sm:$0xf] }
 0x16b   :  { %v2968_v63 = vpop.f32.mrf.mxu0 }
 0x16c   :  { %v2970_v53 = vpop.f32.mrf.mxu1 }
 0x16e   :  { %1317 = vmatpush.bf16.msrb.mxu2 %v761_v4  ;;  %v2185_v4 = vld [vmem:[%s3731_s3 + $0xb4] sm:$0xf0] }
 0x16f   :  { %v3042_v25 = vor.u32 %v2185_v4, %v2108_v27 }
 0x171   :  { %1149 = vmatmul.bf16.gmra.mxu0 %v2972_v61  ;;  %1184 = vmatmul.bf16.gmra.mxu2 %v2974_v14 }
 0x172   :  { %1318 = vmatpush.bf16.msrb.mxu2 %v759_v24  ;;  %v2167_v24 = vld [vmem:[%s3731_s3 + $0x24] sm:$0xf0] }
 0x173   :  { %v542_v15 = vpop.f32.mrf.mxu0  ;;  %v2996_v39 = vor.u32 %v2167_v24, %v2036_v26  ;;  %v2173_v26 = vld [vmem:[%s3731_s3 + $0x54] sm:$0xf0]  ;;  %v2187_v24 = vld [vmem:[%s3731_s3 + $0xc4] sm:$0xf0] }
 0x174   :  { %v631_v12 = vpop.f32.mrf.mxu1  ;;  %v543_v29 = vadd.f32 %v542_v15, %v2707_v46 }
 0x175   :  { %v632_v42 = vadd.f32 %v631_v12, %v2707_v46  ;;  %v2060_v12 = vld [vmem:[%s3731_s3 + $0x50] sm:$0xf] }
 0x176   :  { %1319 = vmatpush.bf16.msrb.mxu2 %v757_v0  ;;  %v700_v62 = vmax.f32 %v543_v29, 0.0  ;;  %v2116_v29 = vld [vmem:[%s3731_s3 + $0xc0] sm:$0xf] }
 0x177   :  { %v701_v21 = vmax.f32 %v632_v42, 0.0 }
 0x17a   :  { %1320 = vmatpush.bf16.msrb.mxu2 %v2896_v50  ;;  %v2181_v50 = vld [vmem:[%s3731_s3 + $0x94] sm:$0xf0] }
 0x17b   :  { %v544_v0 = vpop.f32.mrf.mxu0  ;;  %v2998_v18 = vor.u32 %v2181_v50, %v2092_v40  ;;  %v3062_v50 = vor.u32 %v2173_v26, %v2060_v12 }
 0x17c   :  { %v545_v55 = vadd.f32 %v544_v0, %v2648_v22  ;;  %v633_v41 = vpop.f32.mrf.mxu1  ;;  %v3064_v0 = vor.u32 %v2187_v24, %v2116_v29 }
 0x17d   :  { %v634_v46 = vadd.f32 %v633_v41, %v2648_v22  ;;  %v2044_v22 = vld [vmem:[%s3731_s3 + $0x30] sm:$0xf] }
 0x17e   :  { %1321 = vmatpush.bf16.msrb.mxu2 %v2872_v52  ;;  %v702_v6 = vmax.f32 %v545_v55, 0.0  ;;  %v3020_v20 = vor.u32 %v2169_v19, %v2044_v22 }
 0x17f   :  { %v703_v44 = vmax.f32 %v634_v46, 0.0 }
 0x180   :  { %v3000_v51 = vpack.c.bf16 %v702_v6, %v700_v62  ;;  %v2175_v62 = vld [vmem:[%s3731_s3 + $0x64] sm:$0xf0]  ;;  %v2124_v6 = vld [vmem:[%s3731_s3 + $0xd0] sm:$0xf] }
 0x181   :  { %1154 = vmatmul.bf16.gmra.mxu0 %v2996_v39  ;;  %1189 = vmatmul.bf16.gmra.mxu2 %v2998_v18  ;;  %v3004_v52 = vpack.c.bf16 %v703_v44, %v701_v21  ;;  %v2068_v21 = vld [vmem:[%s3731_s3 + $0x60] sm:$0xf]  ;;  %v2189_v44 = vld [vmem:[%s3731_s3 + $0xd4] sm:$0xf0] }
 0x182   :  { %v3085_v5 = vor.u32 %v2175_v62, %v2068_v21  ;;  %v3087_v11 = vor.u32 %v2189_v44, %v2124_v6 }
 0x183   :  { %v547_v3 = vpop.f32.mrf.mxu0 }
 0x184   :  { %v3018_v7 = vpop.f32.mrf.mxu1 }
 0x18b   :  { %v549_v33 = vpop.f32.mrf.mxu0 }
 0x18c   :  { %v3026_v47 = vpop.f32.mrf.mxu1  ;;  %v550_v21 = vadd.f32 %v549_v33, %v2684_v35  ;;  %v2191_v33 = vld [vmem:[%s3731_s3 + $0xe4] sm:$0xf0] }
 0x191   :  { %1159 = vmatmul.bf16.gmra.mxu0 %v3020_v20  ;;  %1194 = vmatmul.bf16.gmra.mxu2 %v3022_v10 }
 0x193   :  { %v552_v38 = vpop.f32.mrf.mxu0 }
 0x194   :  { %v3044_v30 = vpop.f32.mrf.mxu1 }
 0x19b   :  { %v554_v8 = vpop.f32.mrf.mxu0 }
 0x19c   :  { %v3051_v42 = vpop.f32.mrf.mxu1  ;;  %v555_v26 = vadd.f32 %v554_v8, %v2590_v1  ;;  %v706_v8 = vmax.f32 %v550_v21, 0.0 }
 0x19e   :  { %v710_v62 = vmax.f32 %v555_v26, 0.0 }
 0x1a1   :  { %1164 = vmatmul.bf16.gmra.mxu0 %v3040_v56  ;;  %1199 = vmatmul.bf16.gmra.mxu2 %v3042_v25 }
 0x1a3   :  { %v557_v15 = vpop.f32.mrf.mxu0 }
 0x1a4   :  { %v3068_v41 = vpop.f32.mrf.mxu1  ;;  %v558_v37 = vadd.f32 %v557_v15, %v2623_v13 }
 0x1ab   :  { %v559_v40 = vpop.f32.mrf.mxu0 }
 0x1ac   :  { %v560_v19 = vadd.f32 %v559_v40, %v2577_v60  ;;  %v648_v27 = vpop.f32.mrf.mxu1  ;;  %v553_v40 = vadd.f32 %v552_v38, %v2592_v2  ;;  %v2132_v38 = vld [vmem:[%s3731_s3 + $0xe0] sm:$0xf] }
 0x1ae   :  { %v714_v29 = vmax.f32 %v560_v19, 0.0  ;;  %v708_v6 = vmax.f32 %v553_v40, 0.0  ;;  %v3096_v19 = vpop.permute.xlu0 %238  ;;  %v3786_v40 = vld [vmem:[#allocation7_spill] sm:$0xff] }
 0x1b1   :  { %1169 = vmatmul.bf16.gmra.mxu0 %v3062_v50  ;;  %1204 = vmatmul.bf16.gmra.mxu2 %v3064_v0 }
 0x1b3   :  { %v562_v55 = vpop.f32.mrf.mxu0 }
 0x1b4   :  { %v563_v46 = vadd.f32 %v562_v55, %v2546_v49  ;;  %v712_v55 = vmax.f32 %v558_v37, 0.0  ;;  %v651_v44 = vpop.f32.mrf.mxu1 }
 0x1b6   :  { %v716_v4 = vmax.f32 %v563_v46, 0.0  ;;  %v780_v15 = vpack.c.bf16 %v714_v29, %v712_v55  ;;  %v548_v46 = vadd.f32 %v547_v3, %v2612_v9  ;;  %v540_v3 = vadd.f32 %v2968_v63, %v2674_v32  ;;  %v3117_v63 = vpop.permute.xlu1 %228 }
 0x1b7   :  { %v535_v29 = vadd.f32 %v2936_v23, %v3096_v19  ;;  %v533_v55 = vadd.f32 %v2908_v31, %v3786_v40 }
 0x1b9   :  { %v694_v23 = vmax.f32 %v535_v29, 0.0 }
 0x1bb   :  { %v564_v22 = vpop.f32.mrf.mxu0 }
 0x1bc   :  { %v565_v58 = vadd.f32 %v564_v22, %v2559_v54  ;;  %v778_v22 = vpack.c.bf16 %v710_v62, %v708_v6  ;;  %v653_v62 = vpop.f32.mrf.mxu1 }
 0x1bd   :  { %v654_v31 = vadd.f32 %v653_v62, %v2559_v54  ;;  %v2193_v54 = vld [vmem:[%s3731_s3 + $0xf4] sm:$0xf0] }
 0x1be   :  { %v718_v12 = vmax.f32 %v565_v58, 0.0  ;;  %v704_v58 = vmax.f32 %v548_v46, 0.0 }
 0x1c0   :  { %v782_v24 = vpack.c.bf16 %v718_v12, %v716_v4  ;;  %v776_v37 = vpack.c.bf16 %v706_v8, %v704_v58  ;;  %v3106_v4 = vor.u32 %v2191_v33, %v2132_v38  ;;  %v3785_v12 = vld [vmem:[#allocation6_spill] sm:$0xff]  ;;  %v692_v8 = vmax.f32 %v533_v55, 0.0 }
 0x1c1   :  { %1174 = vmatmul.bf16.gmra.mxu0 %v3085_v5  ;;  %1209 = vmatmul.bf16.gmra.mxu2 %v3087_v11  ;;  %v538_v26 = vadd.f32 %v2952_v17, %v3785_v12  ;;  %v3119_v17 = vpop.permute.xlu0 %223  ;;  %v649_v33 = vadd.f32 %v648_v27, %v2577_v60  ;;  %v647_v60 = vadd.f32 %v3068_v41, %v2623_v13 }
 0x1c2   :  { %1225 = vmatpush.bf16.msrb.mxu1 %v782_v24  ;;  %2202 = vmatpush.bf16.msra.mxu3 %v782_v24  ;;  %3784 = vst [vmem:[#allocation8_spill] sm:$0xff] %v3106_v4  ;;  %v698_v24 = vmax.f32 %v540_v3, 0.0  ;;  %v528_v6 = vadd.f32 %v2884_v48, %v3119_v17  ;;  %v770_v58 = vpack.c.bf16 %v694_v23, %v692_v8  ;;  %v719_v3 = vmax.f32 %v654_v31, 0.0  ;;  %v2022_v48 = vld [vmem:[%s3731_s3 + $0x8] sm:$0xf0] }
 0x1c3   :  { %v696_v21 = vmax.f32 %v538_v26, 0.0  ;;  %v644_v26 = vadd.f32 %v3051_v42, %v2590_v1  ;;  %v642_v41 = vadd.f32 %v3044_v30, %v2592_v2  ;;  %v637_v23 = vadd.f32 %v3018_v7, %v2612_v9 }
 0x1c4   :  { %v688_v38 = vmax.f32 %v528_v6, 0.0  ;;  %v639_v1 = vadd.f32 %v3026_v47, %v2684_v35  ;;  %v627_v9 = vadd.f32 %v2954_v45, %v3785_v12  ;;  %v629_v35 = vadd.f32 %v2970_v53, %v2674_v32  ;;  %v2164_v47 = vld [vmem:[%s3731_s3 + $0x14] sm:$0xf]  ;;  %v2086_v45 = vld [vmem:[%s3731_s3 + $0x88] sm:$0xf0] }
 0x1c5   :  { %v772_v46 = vpack.c.bf16 %v698_v24, %v696_v21  ;;  %v715_v24 = vmax.f32 %v649_v33, 0.0  ;;  %v711_v42 = vmax.f32 %v644_v26, 0.0  ;;  %v709_v6 = vmax.f32 %v642_v41, 0.0  ;;  %v2046_v41 = vld [vmem:[%s3731_s3 + $0x38] sm:$0xf0] }
 0x1c6   :  { %1226 = vmatpush.bf16.msrb.mxu1 %v780_v15  ;;  %2203 = vmatpush.bf16.msra.mxu3 %v780_v15  ;;  %v530_v15 = vadd.f32 %v2900_v16, %v3117_v63  ;;  %v2140_v16 = vld [vmem:[%s3731_s3 + $0xf0] sm:$0xf]  ;;  %v705_v31 = vmax.f32 %v637_v23, 0.0  ;;  %v707_v2 = vmax.f32 %v639_v1, 0.0  ;;  %v622_v32 = vadd.f32 %v2910_v34, %v3786_v40 }
 0x1c7   :  { %v3150_v21 = vor.u32 %v2193_v54, %v2140_v16  ;;  %v779_v30 = vpack.c.bf16 %v711_v42, %v709_v6  ;;  %v624_v53 = vadd.f32 %v2938_v36, %v3096_v19  ;;  %v697_v12 = vmax.f32 %v627_v9, 0.0 }
 0x1c8   :  { %v777_v7 = vpack.c.bf16 %v707_v2, %v705_v31  ;;  %v619_v16 = vadd.f32 %v2902_v28, %v3117_v63  ;;  %v693_v54 = vmax.f32 %v622_v32, 0.0  ;;  %v2166_v28 = vld [vmem:[%s3731_s3 + $0x24] sm:$0xf]  ;;  %v2038_v63 = vld [vmem:[%s3731_s3 + $0x28] sm:$0xf0] }
 0x1c9   :  { %3787 = vst [vmem:[#allocation6_spill] sm:$0xff] %v3150_v21 }
 0x1ca   :  { %1227 = vmatpush.bf16.msrb.mxu1 %v778_v22  ;;  %2204 = vmatpush.bf16.msra.mxu3 %v778_v22  ;;  %v652_v22 = vadd.f32 %v651_v44, %v2546_v49  ;;  %v2162_v49 = vld [vmem:[%s3731_s3 + $0x4] sm:$0xf]  ;;  %v2176_v44 = vld [vmem:[%s3731_s3 + $0x74] sm:$0xf] }
 0x1cb   :  { %v3152_v62 = vor.u32 %v2162_v49, %v2022_v48  ;;  %v695_v49 = vmax.f32 %v624_v53, 0.0  ;;  %v2094_v48 = vld [vmem:[%s3731_s3 + $0x98] sm:$0xf0] }
 0x1cc   :  { %v717_v27 = vmax.f32 %v652_v22, 0.0  ;;  %v2030_v22 = vld [vmem:[%s3731_s3 + $0x18] sm:$0xf0] }
 0x1cd   :  { %v771_v40 = vpack.c.bf16 %v695_v49, %v693_v54  ;;  %v2118_v49 = vld [vmem:[%s3731_s3 + $0xc8] sm:$0xf0] }
 0x1ce   :  { %1228 = vmatpush.bf16.msrb.mxu1 %v776_v37  ;;  %2205 = vmatpush.bf16.msra.mxu3 %v776_v37  ;;  %v2078_v37 = vld [vmem:[%s3731_s3 + $0x78] sm:$0xf0]  ;;  %v783_v55 = vpack.c.bf16 %v719_v3, %v717_v27  ;;  %v617_v3 = vadd.f32 %v2887_v43, %v3119_v17  ;;  %v3217_v27 = vor.u32 %v2166_v28, %v2038_v63 }
 0x1cf   :  { %v3154_v13 = vor.u32 %v2176_v44, %v2078_v37  ;;  %v3224_v37 = vpop.permute.xlu0 %823 }
 0x1d0   :  { %v689_v19 = vmax.f32 %v617_v3, 0.0  ;;  %3792 = vst [vmem:[#allocation12_spill] sm:$0xff] %v3224_v37  ;;  %v2172_v3 = vld [vmem:[%s3731_s3 + $0x54] sm:$0xf] }
 0x1d1   :  { %1214 = vmatmul.bf16.gmra.mxu2 %v3106_v4  ;;  %3788 = vst [vmem:[#allocation7_spill] sm:$0xff] %v3154_v13 }
 0x1d2   :  { %1229 = vmatpush.bf16.msrb.mxu1 %v3000_v51  ;;  %2206 = vmatpush.bf16.msra.mxu3 %v3000_v51  ;;  %v690_v51 = vmax.f32 %v530_v15, 0.0  ;;  %v713_v15 = vmax.f32 %v647_v60, 0.0  ;;  %v3215_v60 = vpop.permute.xlu2 %818 }
 0x1d3   :  { %3790 = vst [vmem:[#allocation10_spill] sm:$0xff] %v3215_v60 }
 0x1d4   :  { %v768_v29 = vpack.c.bf16 %v690_v51, %v688_v38  ;;  %v2178_v51 = vld [vmem:[%s3731_s3 + $0x84] sm:$0xf]  ;;  %v3187_v38 = vor.u32 %v2164_v47, %v2030_v22  ;;  %v2054_v47 = vld [vmem:[%s3731_s3 + $0x48] sm:$0xf0]  ;;  %v2110_v22 = vld [vmem:[%s3731_s3 + $0xb8] sm:$0xf0] }
 0x1d5   :  { %v3189_v33 = vor.u32 %v2178_v51, %v2086_v45 }
 0x1d6   :  { %1230 = vmatpush.bf16.msrb.mxu1 %v772_v46  ;;  %2207 = vmatpush.bf16.msra.mxu3 %v772_v46  ;;  %v781_v46 = vpack.c.bf16 %v715_v24, %v713_v15  ;;  %v2102_v15 = vld [vmem:[%s3731_s3 + $0xa8] sm:$0xf0] }
 0x1d7   :  { %3789 = vst [vmem:[#allocation9_spill] sm:$0xff] %v3189_v33  ;;  %v3244_v23 = vpop.permute.xlu0 %838 }
 0x1da   :  { %1231 = vmatpush.bf16.msrb.mxu1 %v770_v58  ;;  %2208 = vmatpush.bf16.msra.mxu3 %v770_v58  ;;  %v699_v58 = vmax.f32 %v629_v35, 0.0  ;;  %v3230_v24 = vpop.permute.xlu2 %833 }
 0x1db   :  { %3794 = vst [vmem:[#allocation14_spill] sm:$0xff] %v3230_v24 }
 0x1dc   :  { %v773_v36 = vpack.c.bf16 %v699_v58, %v697_v12 }
 0x1de   :  { %1232 = vmatpush.bf16.msrb.mxu1 %v768_v29  ;;  %2209 = vmatpush.bf16.msra.mxu3 %v768_v29  ;;  %v3228_v29 = vpop.permute.xlu1 %828 }
 0x1df   :  { %3793 = vst [vmem:[#allocation13_spill] sm:$0xff] %v3228_v29  ;;  %v3259_v2 = vpop.permute.xlu0 %853 }
 0x1e1   :  { %1219 = vmatmul.bf16.gmra.mxu2 %v3150_v21  ;;  %1233 = vmatmul.bf16.vlgmr.msrb.gmra.mxu1 %v3152_v62 }
 0x1e2   :  { %1403 = vmatpush.bf16.msrb.mxu3 %v783_v55  ;;  %v2168_v55 = vld [vmem:[%s3731_s3 + $0x34] sm:$0xf]  ;;  %v3254_v31 = vpop.permute.xlu2 %848 }
 0x1e3   :  { %1268 = vmatmul.bf16.vlgmr.msra.gmra.mxu3 %v3154_v13  ;;  %v3246_v1 = vor.u32 %v2168_v55, %v2046_v41  ;;  %v2174_v55 = vld [vmem:[%s3731_s3 + $0x64] sm:$0xf]  ;;  %v2070_v41 = vld [vmem:[%s3731_s3 + $0x68] sm:$0xf0]  ;;  %v2192_v13 = vld [vmem:[%s3731_s3 + $0xf4] sm:$0xf] }
 0x1e4   :  { %v3165_v8 = vpop.f32.mrf.mxu2 }
 0x1e6   :  { %1404 = vmatpush.bf16.msrb.mxu3 %v781_v46  ;;  %v3252_v6 = vpop.permute.xlu1 %843 }
 0x1e7   :  { %v3283_v32 = vpop.permute.xlu0 %868 }
 0x1ea   :  { %1405 = vmatpush.bf16.msrb.mxu3 %v779_v30  ;;  %v3265_v35 = vpop.permute.xlu2 %863 }
 0x1ec   :  { %v3196_v34 = vpop.f32.mrf.mxu2 }
 0x1ee   :  { %1406 = vmatpush.bf16.msrb.mxu3 %v777_v7  ;;  %v3263_v9 = vpop.permute.xlu1 %858  ;;  %v2170_v7 = vld [vmem:[%s3731_s3 + $0x44] sm:$0xf] }
 0x1ef   :  { %v3279_v51 = vor.u32 %v2170_v7, %v2054_v47  ;;  %v3300_v54 = vpop.permute.xlu0 %883 }
 0x1f0   :  { %3797 = vst [vmem:[#allocation17_spill] sm:$0xff] %v3300_v54 }
 0x1f1   :  { %1238 = vmatmul.bf16.gmra.mxu1 %v3187_v38  ;;  %1322 = vmatmul.bf16.vlgmr.msrb.gmra.mxu2 %v2940_v57  ;;  %v2180_v57 = vld [vmem:[%s3731_s3 + $0x94] sm:$0xf] }
 0x1f2   :  { %1407 = vmatpush.bf16.msrb.mxu3 %v3004_v52  ;;  %v691_v52 = vmax.f32 %v619_v16, 0.0  ;;  %v3219_v44 = vor.u32 %v2180_v57, %v2094_v48  ;;  %v3292_v58 = vpop.permute.xlu2 %878  ;;  %v2062_v16 = vld [vmem:[%s3731_s3 + $0x58] sm:$0xf0] }
 0x1f3   :  { %1273 = vmatmul.bf16.gmra.mxu3 %v3189_v33 }
 0x1f4   :  { %v769_v43 = vpack.c.bf16 %v691_v52, %v689_v19  ;;  %v3207_v17 = vpop.f32.mrf.mxu2  ;;  %3791 = vst [vmem:[#allocation11_spill] sm:$0xff] %v3219_v44  ;;  %v3310_v19 = vor.u32 %v2172_v3, %v2062_v16 }
 0x1f6   :  { %1408 = vmatpush.bf16.msrb.mxu3 %v773_v36  ;;  %v3290_v12 = vpop.permute.xlu1 %873  ;;  %3798 = vst [vmem:[#allocation18_spill] sm:$0xff] %v3310_v19 }
 0x1f7   :  { %v3321_v28 = vpop.permute.xlu0 %898 }
 0x1f8   :  { %3802 = vst [vmem:[#allocation22_spill] sm:$0xff] %v3321_v28 }
 0x1fa   :  { %1409 = vmatpush.bf16.msrb.mxu3 %v771_v40  ;;  %v3314_v40 = vpop.permute.xlu2 %893 }
 0x1fb   :  { %3800 = vst [vmem:[#allocation20_spill] sm:$0xff] %v3314_v40 }
 0x1fc   :  { %v3226_v26 = vpop.f32.mrf.mxu2 }
 0x1fe   :  { %1410 = vmatpush.bf16.msrb.mxu3 %v769_v43  ;;  %v3312_v52 = vpop.permute.xlu1 %888 }
 0x1ff   :  { %3799 = vst [vmem:[#allocation19_spill] sm:$0xff] %v3312_v52  ;;  %v3345_v47 = vpop.permute.xlu0 %913 }
 0x200   :  { %3807 = vst [vmem:[#allocation27_spill] sm:$0xff] %v3345_v47 }
 0x201   :  { %1243 = vmatmul.bf16.gmra.mxu1 %v3217_v27  ;;  %1327 = vmatmul.bf16.gmra.mxu2 %v2972_v61  ;;  %v2182_v61 = vld [vmem:[%s3731_s3 + $0xa4] sm:$0xf] }
 0x202   :  { %v3248_v42 = vor.u32 %v2182_v61, %v2102_v15  ;;  %v3327_v48 = vpop.permute.xlu2 %908  ;;  %v2126_v61 = vld [vmem:[%s3731_s3 + $0xd8] sm:$0xf0]  ;;  %v3341_v15 = vor.u32 %v2174_v55, %v2070_v41  ;;  %v2190_v41 = vld [vmem:[%s3731_s3 + $0xe4] sm:$0xf] }
 0x203   :  { %1278 = vmatmul.bf16.gmra.mxu3 %v3219_v44  ;;  %3804 = vst [vmem:[#allocation24_spill] sm:$0xff] %v3327_v48 }
 0x204   :  { %3795 = vst [vmem:[#allocation15_spill] sm:$0xff] %v3248_v42  ;;  %v3250_v46 = vpop.f32.mrf.mxu2 }
 0x205   :  { %3805 = vst [vmem:[#allocation25_spill] sm:$0xff] %v3341_v15 }
 0x206   :  { %v3325_v57 = vpop.permute.xlu1 %903 }
 0x207   :  { %3803 = vst [vmem:[#allocation23_spill] sm:$0xff] %v3325_v57 }
 0x20a   :  { %v3353_v16 = vpop.permute.xlu2 %923 }
 0x20b   :  { %3809 = vst [vmem:[#allocation29_spill] sm:$0xff] %v3353_v16 }
 0x20c   :  { %v3261_v30 = vpop.f32.mrf.mxu2 }
 0x20e   :  { %v3351_v3 = vpop.permute.xlu1 %918 }
 0x20f   :  { %3808 = vst [vmem:[#allocation28_spill] sm:$0xff] %v3351_v3 }
 0x211   :  { %1248 = vmatmul.bf16.gmra.mxu1 %v3246_v1  ;;  %1332 = vmatmul.bf16.gmra.mxu2 %v2996_v39  ;;  %v2184_v39 = vld [vmem:[%s3731_s3 + $0xb4] sm:$0xf] }
 0x212   :  { %v3281_v45 = vor.u32 %v2184_v39, %v2110_v22  ;;  %v1145_v39 = vpop.f32.mrf.mxu0 }
 0x213   :  { %1283 = vmatmul.bf16.gmra.mxu3 %v3248_v42 }
 0x214   :  { %3796 = vst [vmem:[#allocation16_spill] sm:$0xff] %v3281_v45  ;;  %v3288_v53 = vpop.f32.mrf.mxu2 }
 0x21c   :  { %v3308_v36 = vpop.f32.mrf.mxu2 }
 0x221   :  { %1253 = vmatmul.bf16.gmra.mxu1 %v3279_v51  ;;  %1337 = vmatmul.bf16.gmra.mxu2 %v3020_v20  ;;  %v2186_v20 = vld [vmem:[%s3731_s3 + $0xc4] sm:$0xf] }
 0x222   :  { %v3316_v43 = vor.u32 %v2186_v20, %v2118_v49  ;;  %v3356_v20 = vpop.permute.xlu0 %928  ;;  %v1147_v49 = vpop.f32.mrf.mxu0 }
 0x223   :  { %1288 = vmatmul.bf16.gmra.mxu3 %v3281_v45  ;;  %3810 = vst [vmem:[#allocation30_spill] sm:$0xff] %v3356_v20 }
 0x224   :  { %3801 = vst [vmem:[#allocation21_spill] sm:$0xff] %v3316_v43  ;;  %v3323_v63 = vpop.f32.mrf.mxu2 }
 0x22a   :  { %v1150_v45 = vpop.f32.mrf.mxu0 }
 0x22c   :  { %v3347_v22 = vpop.f32.mrf.mxu2 }
 0x231   :  { %1258 = vmatmul.bf16.gmra.mxu1 %v3310_v19  ;;  %1342 = vmatmul.bf16.gmra.mxu2 %v3040_v56  ;;  %v2188_v56 = vld [vmem:[%s3731_s3 + $0xd4] sm:$0xf] }
 0x232   :  { %v3343_v7 = vor.u32 %v2188_v56, %v2126_v61  ;;  %v2134_v56 = vld [vmem:[%s3731_s3 + $0xe8] sm:$0xf0]  ;;  %v3368_v61 = vpop.permute.xlu2 %938 }
 0x233   :  { %1293 = vmatmul.bf16.gmra.mxu3 %v3316_v43  ;;  %3812 = vst [vmem:[#allocation32_spill] sm:$0xff] %v3368_v61  ;;  %v3370_v43 = vor.u32 %v2190_v41, %v2134_v56  ;;  %v2142_v41 = vld [vmem:[%s3731_s3 + $0xf8] sm:$0xf0]  ;;  %v1146_v56 = vadd.f32 %v1145_v39, %v3215_v60  ;;  %v1148_v39 = vadd.f32 %v1147_v49, %v3224_v37  ;;  %s2242_s3 = smov [#allocation3]  }
 0x234   :  { %3806 = vst [vmem:[#allocation26_spill] sm:$0xff] %v3343_v7  ;;  %v3358_v55 = vpop.f32.mrf.mxu2  ;;  %s1911_s18 = sshll.u32 %s2242_s3, 4  ;;  %s1912_s18 = int_to_ptr.vmem [resolvable:$true] %s1911_s18 }
 0x235   :  { %3813 = vst [vmem:[#allocation33_spill] sm:$0xff] %v3370_v43 }
 0x23a   :  { %v3380_v33 = vpop.permute.xlu2 %953 }
 0x23b   :  { %3815 = vst [vmem:[#allocation35_spill] sm:$0xff] %v3380_v33 }
 0x23c   :  { %v3376_v42 = vpop.f32.mrf.mxu2 }
 0x241   :  { %1263 = vmatmul.bf16.gmra.mxu1 %v3341_v15  ;;  %1347 = vmatmul.bf16.gmra.mxu2 %v3062_v50  ;;  %v3366_v50 = vpop.permute.xlu1 %933  ;;  %v3393_v15 = vor.u32 %v2192_v13, %v2142_v41 }
 0x242   :  { %3811 = vst [vmem:[#allocation31_spill] sm:$0xff] %v3366_v50 }
 0x243   :  { %1298 = vmatmul.bf16.gmra.mxu3 %v3343_v7  ;;  %v3374_v7 = vpop.permute.xlu0 %943  ;;  %3817 = vst [vmem:[#allocation37_spill] sm:$0xff] %v3393_v15 }
 0x244   :  { %v3395_v4 = vpop.f32.mrf.mxu2 }
 0x245   :  { %3818 = vst [vmem:[#allocation38_spill] sm:$0xff] %v3395_v4 }
 0x249   :  { %v3378_v44 = vpop.permute.xlu1 %948 }
 0x24a   :  { %3814 = vst [vmem:[#allocation34_spill] sm:$0xff] %v3378_v44  ;;  %v3399_v44 = vpop.permute.xlu2 %968 }
 0x24b   :  { %3820 = vst [vmem:[#allocation40_spill] sm:$0xff] %v3399_v44 }
 0x24c   :  { %v3412_v44 = vpop.f32.mrf.mxu2 }
 0x24d   :  { %3822 = vst [vmem:[#allocation42_spill] sm:$0xff] %v3412_v44 }
 0x251   :  { %1352 = vmatmul.bf16.gmra.mxu2 %v3085_v5  ;;  %v3388_v5 = vpop.permute.xlu0 %958  ;;  %v3397_v54 = vpop.permute.xlu1 %963 }
 0x252   :  { %3816 = vst [vmem:[#allocation36_spill] sm:$0xff] %v3388_v5  ;;  %v1181_v5 = vadd.f32 %v3165_v8, %v3312_v52 }
 0x253   :  { %1303 = vmatmul.bf16.gmra.mxu3 %v3370_v43  ;;  %v3391_v43 = vpop.f32.mrf.mxu0  ;;  %3819 = vst [vmem:[#allocation39_spill] sm:$0xff] %v3397_v54 }
 0x259   :  { %v3414_v54 = vpop.permute.xlu1 %1590 }
 0x25a   :  { %3823 = vst [vmem:[#allocation43_spill] sm:$0xff] %v3414_v54 }
 0x25e   :  { %v1234_v21 = vpop.f32.mrf.mxu1 }
 0x25f   :  { %v1235_v33 = vadd.f32 %v1234_v21, %v1146_v56  ;;  %v3408_v21 = vpop.permute.xlu0 %973  ;;  %v3410_v56 = vpop.f32.mrf.mxu0 }
 0x260   :  { %3821 = vst [vmem:[#allocation41_spill] sm:$0xff] %v3408_v21 }
 0x261   :  { %1357 = vmatmul.bf16.gmra.mxu2 %v2942_v59  ;;  %v1492_v41 = vmax.f32 %v1235_v33, 0.0  ;;  %v1151_v33 = vadd.f32 %v1150_v45, %v3228_v29  ;;  %v1186_v45 = vadd.f32 %v3207_v17, %v3321_v28  ;;  %v1191_v17 = vadd.f32 %v3250_v46, %v3327_v48 }
 0x262   :  { %v1196_v46 = vadd.f32 %v3288_v53, %v3351_v3 }
 0x263   :  { %1308 = vmatmul.bf16.gmra.mxu3 %v3393_v15  ;;  %v3416_v15 = vpop.permute.xlu2 %1595  ;;  %v1748_v8 = vmul.f32 %v3414_v54, %v1492_v41  ;;  %v3431_v41 = vpop.f32.mrf.mxu2 }
 0x264   :  { %3824 = vst [vmem:[#allocation44_spill] sm:$0xff] %v3416_v15 }
 0x266   :  { %v1269_v60 = vpop.f32.mrf.mxu3  ;;  %v1236_v13 = vpop.f32.mrf.mxu1 }
 0x267   :  { %v3406_v19 = vadd.f32 %v1269_v60, %v1181_v5  ;;  %v1237_v4 = vadd.f32 %v1236_v13, %v1148_v39  ;;  %v1183_v60 = vadd.f32 %v3196_v34, %v3314_v40  ;;  %v3426_v21 = vpop.permute.xlu0 %1600  ;;  %v3428_v44 = vpop.f32.mrf.mxu0 }
 0x268   :  { %3825 = vst [vmem:[#allocation45_spill] sm:$0xff] %v3426_v21 }
 0x269   :  { %v1494_v59 = vmax.f32 %v1237_v4, 0.0 }
 0x26b   :  { %v1750_v49 = vmul.f32 %v3416_v15, %v1494_v59 }
 0x26d   :  { %v1812_v5 = vadd.f32 %v1750_v49, %v1748_v8 }
 0x26e   :  { %v1271_v39 = vpop.f32.mrf.mxu3  ;;  %v1239_v52 = vpop.f32.mrf.mxu1 }
 0x26f   :  { %v3423_v13 = vadd.f32 %v1271_v39, %v1183_v60  ;;  %v1240_v37 = vadd.f32 %v1239_v52, %v1151_v33  ;;  %v1160_v49 = vpop.f32.mrf.mxu0  ;;  %v3442_v60 = vpop.f32.mrf.mxu2 }
 0x270   :  { %3826 = vst [vmem:[#allocation46_spill] sm:$0xff] %v3442_v60 }
 0x271   :  { %v1496_v4 = vmax.f32 %v1240_v37, 0.0  ;;  %1362 = vmatmul.bf16.gmra.mxu2 %v2974_v14  ;;  %v1188_v14 = vadd.f32 %v3226_v26, %v3325_v57 }
 0x273   :  { %1411 = vmatmul.bf16.vlgmr.msrb.gmra.mxu3 %v3152_v62  ;;  %v1752_v34 = vmul.f32 %v3426_v21, %v1496_v4 }
 0x275   :  { %v3436_v59 = vadd.f32 %v1812_v5, %v1752_v34 }
 0x276   :  { %v1274_v8 = vpop.f32.mrf.mxu3  ;;  %v1241_v37 = vpop.f32.mrf.mxu1 }
 0x277   :  { %v3438_v52 = vadd.f32 %v1274_v8, %v1186_v45  ;;  %v1162_v4 = vpop.f32.mrf.mxu0  ;;  %v3452_v26 = vpop.f32.mrf.mxu2  ;;  %v1193_v8 = vadd.f32 %v3261_v30, %v3345_v47 }
 0x278   :  { %3827 = vst [vmem:[#allocation47_spill] sm:$0xff] %v3452_v26  ;;  %v3468_v47 = vpop.permute.xlu2 %1610 }
 0x27e   :  { %v1276_v62 = vpop.f32.mrf.mxu3  ;;  %v1244_v39 = vpop.f32.mrf.mxu1 }
 0x27f   :  { %v3444_v33 = vadd.f32 %v1276_v62, %v1188_v14  ;;  %v3458_v28 = vpop.f32.mrf.mxu2 }
 0x280   :  { %3828 = vst [vmem:[#allocation48_spill] sm:$0xff] %v3458_v28  ;;  %v3480_v3 = vpop.permute.xlu2 %1625 }
 0x281   :  { %1367 = vmatmul.bf16.gmra.mxu2 %v2998_v18  ;;  %v1165_v18 = vpop.f32.mrf.mxu0 }
 0x283   :  { %1416 = vmatmul.bf16.gmra.mxu3 %v3187_v38  ;;  %v3461_v38 = vpop.permute.xlu1 %1605 }
 0x286   :  { %v1279_v5 = vpop.f32.mrf.mxu3  ;;  %v1246_v45 = vpop.f32.mrf.mxu1 }
 0x287   :  { %v3450_v34 = vadd.f32 %v1279_v5, %v1191_v17  ;;  %v3472_v48 = vpop.f32.mrf.mxu2 }
 0x288   :  { %3829 = vst [vmem:[#allocation49_spill] sm:$0xff] %v3472_v48 }
 0x28b   :  { %v3474_v40 = vpop.permute.xlu1 %1620 }
 0x28e   :  { %v1281_v14 = vpop.f32.mrf.mxu3  ;;  %v1249_v57 = vpop.f32.mrf.mxu1 }
 0x28f   :  { %v3456_v62 = vadd.f32 %v1281_v14, %v1193_v8  ;;  %v3470_v8 = vpop.permute.xlu0 %1615  ;;  %v1167_v14 = vpop.f32.mrf.mxu0 }
 0x290   :  { %v3488_v15 = vpop.f32.mrf.mxu2 }
 0x291   :  { %1372 = vmatmul.bf16.gmra.mxu2 %v3022_v10  ;;  %v1198_v10 = vadd.f32 %v3308_v36, %v3353_v16  ;;  %3830 = vst [vmem:[#allocation50_spill] sm:$0xff] %v3488_v15  ;;  %v3494_v16 = vpop.permute.xlu2 %1640 }
 0x293   :  { %1421 = vmatmul.bf16.gmra.mxu3 %v3217_v27  ;;  %v3490_v36 = vpop.permute.xlu1 %1635 }
 0x296   :  { %v1284_v17 = vpop.f32.mrf.mxu3  ;;  %v1251_v30 = vpop.f32.mrf.mxu1 }
 0x297   :  { %v3466_v5 = vadd.f32 %v1284_v17, %v1196_v46  ;;  %v3484_v46 = vpop.permute.xlu0 %1630  ;;  %v1201_v17 = vadd.f32 %v3323_v63, %v3356_v20  ;;  %v1170_v29 = vpop.f32.mrf.mxu0  ;;  %v1156_v63 = vadd.f32 %v3410_v56, %v3244_v23 }
 0x299   :  { %v1245_v60 = vadd.f32 %v1244_v39, %v1156_v63  ;;  %v3518_v39 = vpop.permute.xlu2 %1655 }
 0x29b   :  { %v1500_v56 = vmax.f32 %v1245_v60, 0.0 }
 0x29d   :  { %v1756_v60 = vmul.f32 %v3468_v47, %v1500_v56 }
 0x29e   :  { %v1286_v27 = vpop.f32.mrf.mxu3  ;;  %v1254_v53 = vpop.f32.mrf.mxu1 }
 0x29f   :  { %v3478_v21 = vadd.f32 %v1286_v27, %v1198_v10  ;;  %v3500_v48 = vpop.permute.xlu0 %1645  ;;  %v1172_v28 = vpop.f32.mrf.mxu0 }
 0x2a1   :  { %1377 = vmatmul.bf16.gmra.mxu2 %v3042_v25  ;;  %v1153_v25 = vadd.f32 %v3391_v43, %v3230_v24  ;;  %v3510_v43 = vpop.permute.xlu1 %1650 }
 0x2a3   :  { %1426 = vmatmul.bf16.gmra.mxu3 %v3246_v1  ;;  %v1203_v1 = vadd.f32 %v3347_v22, %v3366_v50  ;;  %v1242_v20 = vadd.f32 %v1241_v37, %v1153_v25  ;;  %v1161_v22 = vadd.f32 %v1160_v49, %v3254_v31  ;;  %v1166_v25 = vadd.f32 %v1165_v18, %v3263_v9 }
 0x2a5   :  { %v1498_v50 = vmax.f32 %v1242_v20, 0.0  ;;  %v1250_v37 = vadd.f32 %v1249_v57, %v1161_v22 }
 0x2a6   :  { %v1289_v54 = vpop.f32.mrf.mxu3  ;;  %v1256_v27 = vpop.f32.mrf.mxu1 }
 0x2a7   :  { %v3492_v10 = vadd.f32 %v1289_v54, %v1201_v17  ;;  %v1158_v17 = vadd.f32 %v3428_v44, %v3252_v6  ;;  %v1206_v44 = vadd.f32 %v3358_v55, %v3368_v61  ;;  %v1504_v57 = vmax.f32 %v1250_v37, 0.0  ;;  %v1175_v22 = vpop.f32.mrf.mxu0 }
 0x2a8   :  { %v1171_v55 = vadd.f32 %v1170_v29, %v3283_v32  ;;  %v1208_v29 = vadd.f32 %v3376_v42, %v3374_v7 }
 0x2a9   :  { %3831 = vst [vmem:[#allocation51_spill] sm:$0xff] %v3492_v10  ;;  %v3508_v10 = vpop.f32.mrf.mxu2  ;;  %v1247_v24 = vadd.f32 %v1246_v45, %v1158_v17  ;;  %v3526_v17 = vpop.permute.xlu0 %1660 }
 0x2ab   :  { %v1502_v49 = vmax.f32 %v1247_v24, 0.0 }
 0x2ad   :  { %v1758_v24 = vmul.f32 %v3470_v8, %v1502_v49 }
 0x2ae   :  { %v1291_v15 = vpop.f32.mrf.mxu3  ;;  %v1259_v54 = vpop.f32.mrf.mxu1 }
 0x2af   :  { %v3504_v26 = vadd.f32 %v1291_v15, %v1203_v1  ;;  %v1163_v15 = vadd.f32 %v1162_v4, %v3259_v2  ;;  %v1754_v1 = vmul.f32 %v3461_v38, %v1498_v50  ;;  %v1255_v4 = vadd.f32 %v1254_v53, %v1166_v25 }
 0x2b0   :  { %v1760_v53 = vmul.f32 %v3474_v40, %v1504_v57  ;;  %v1260_v25 = vadd.f32 %v1259_v54, %v1171_v55 }
 0x2b1   :  { %1382 = vmatmul.bf16.gmra.mxu2 %v3064_v0  ;;  %v1252_v20 = vadd.f32 %v1251_v30, %v1163_v15  ;;  %v1814_v18 = vadd.f32 %v3436_v59, %v1754_v1  ;;  %v3531_v50 = vpop.f32.mrf.mxu2  ;;  %v1508_v37 = vmax.f32 %v1255_v4, 0.0  ;;  %v1176_v59 = vadd.f32 %v1175_v22, %v3292_v58 }
 0x2b2   :  { %v1512_v54 = vmax.f32 %v1260_v25, 0.0 }
 0x2b3   :  { %1431 = vmatmul.bf16.gmra.mxu3 %v3279_v51  ;;  %v1168_v51 = vadd.f32 %v1167_v14, %v3265_v35  ;;  %v1506_v30 = vmax.f32 %v1252_v20, 0.0  ;;  %v1173_v14 = vadd.f32 %v1172_v28, %v3290_v12  ;;  %v1815_v56 = vadd.f32 %v1814_v18, %v1756_v60  ;;  %v3543_v28 = vpop.permute.xlu2 %1670  ;;  %v3548_v18 = vpop.permute.xlu0 %1675 }
 0x2b4   :  { %v1764_v57 = vmul.f32 %v3484_v46, %v1508_v37  ;;  %v3834_v37 = vld [vmem:[#allocation38_spill] sm:$0xff] }
 0x2b5   :  { %v1257_v15 = vadd.f32 %v1256_v27, %v1168_v51  ;;  %v1816_v1 = vadd.f32 %v1815_v56, %v1758_v24  ;;  %v1762_v49 = vmul.f32 %v3480_v3, %v1506_v30  ;;  %v3832_v24 = vld [vmem:[#allocation18_spill] sm:$0xff] }
 0x2b6   :  { %v1294_v45 = vpop.f32.mrf.mxu3  ;;  %v1261_v0 = vpop.f32.mrf.mxu1 }
 0x2b7   :  { %v3522_v63 = vadd.f32 %v1294_v45, %v1206_v44  ;;  %v3533_v44 = vpop.permute.xlu1 %1665  ;;  %v1510_v45 = vmax.f32 %v1257_v15, 0.0  ;;  %v1262_v20 = vadd.f32 %v1261_v0, %v1173_v14  ;;  %v1817_v60 = vadd.f32 %v1816_v1, %v1760_v53  ;;  %v1177_v0 = vpop.f32.mrf.mxu0 }
 0x2b8   :  { %v1768_v14 = vmul.f32 %v3494_v16, %v1512_v54 }
 0x2b9   :  { %v1818_v55 = vadd.f32 %v1817_v60, %v1762_v49  ;;  %v1766_v42 = vmul.f32 %v3490_v36, %v1510_v45  ;;  %v1514_v22 = vmax.f32 %v1262_v20, 0.0  ;;  %v3551_v30 = vpop.f32.mrf.mxu2 }
 0x2bb   :  { %v1819_v15 = vadd.f32 %v1818_v55, %v1764_v57  ;;  %v3563_v54 = vpop.permute.xlu2 %1685 }
 0x2bd   :  { %v1820_v1 = vadd.f32 %v1819_v15, %v1766_v42  ;;  %v3836_v15 = vld [vmem:[#allocation35_spill] sm:$0xff] }
 0x2be   :  { %v1296_v27 = vpop.f32.mrf.mxu3  ;;  %v1264_v61 = vpop.f32.mrf.mxu1 }
 0x2bf   :  { %v3541_v51 = vadd.f32 %v1296_v27, %v1208_v29  ;;  %v1265_v4 = vadd.f32 %v1264_v61, %v1176_v59  ;;  %v3554_v53 = vpop.permute.xlu1 %1680  ;;  %v3833_v61 = vld [vmem:[#allocation34_spill] sm:$0xff]  ;;  %v3835_v29 = vld [vmem:[#allocation17_spill] sm:$0xff]  ;;  %v1821_v27 = vadd.f32 %v1820_v1, %v1768_v14 }
 0x2c0   :  { %v1211_v25 = vadd.f32 %v3834_v37, %v3833_v61  ;;  %v1178_v59 = vadd.f32 %v1177_v0, %v3835_v29  ;;  %v1522_v37 = vmax.f32 %v3423_v13, 0.0 }
 0x2c1   :  { %1387 = vmatmul.bf16.gmra.mxu2 %v3087_v11  ;;  %v1516_v56 = vmax.f32 %v1265_v4, 0.0  ;;  %v1770_v11 = vmul.f32 %v3500_v48, %v1514_v22  ;;  %v1520_v4 = vmax.f32 %v3406_v19, 0.0  ;;  %v3568_v22 = vpop.permute.xlu0 %1690 }
 0x2c2   :  { %v1778_v13 = vmul.f32 %v3533_v44, %v1522_v37  ;;  %v3840_v37 = vld [vmem:[#allocation36_spill] sm:$0xff] }
 0x2c3   :  { %1436 = vmatmul.bf16.gmra.mxu3 %v3832_v24  ;;  %v1772_v60 = vmul.f32 %v3510_v43, %v1516_v56  ;;  %v1822_v55 = vadd.f32 %v1821_v27, %v1770_v11  ;;  %v1776_v14 = vmul.f32 %v3526_v17, %v1520_v4  ;;  %v1524_v56 = vmax.f32 %v3438_v52, 0.0  ;;  %v3838_v4 = vld [vmem:[#allocation8_spill] sm:$0xff]  ;;  %v3839_v52 = vld [vmem:[#allocation25_spill] sm:$0xff] }
 0x2c4   :  { %v1526_v27 = vmax.f32 %v3444_v33, 0.0  ;;  %v1216_v33 = vadd.f32 %v3431_v41, %v3840_v37 }
 0x2c5   :  { %v1823_v0 = vadd.f32 %v1822_v55, %v1772_v60  ;;  %v1528_v55 = vmax.f32 %v3450_v34, 0.0 }
 0x2c6   :  { %v1299_v49 = vpop.f32.mrf.mxu3  ;;  %v1266_v20 = vpop.f32.mrf.mxu1 }
 0x2c7   :  { %v3560_v45 = vadd.f32 %v1299_v49, %v1211_v25  ;;  %v1267_v57 = vadd.f32 %v1266_v20, %v1178_v59  ;;  %v3837_v25 = vld [vmem:[#allocation42_spill] sm:$0xff]  ;;  %v3574_v59 = vpop.f32.mrf.mxu2  ;;  %v3576_v11 = vpop.permute.xlu1 %1695 }
 0x2c8   :  { %v1213_v49 = vadd.f32 %v3837_v25, %v3836_v15  ;;  %v3584_v25 = vpop.permute.xlu2 %1700 }
 0x2c9   :  { %v1518_v24 = vmax.f32 %v1267_v57, 0.0  ;;  %v1780_v57 = vmul.f32 %v3543_v28, %v1524_v56  ;;  %v1532_v56 = vmax.f32 %v3466_v5, 0.0 }
 0x2cb   :  { %v1774_v42 = vmul.f32 %v3518_v39, %v1518_v24  ;;  %v1788_v41 = vmul.f32 %v3568_v22, %v1532_v56 }
 0x2cd   :  { %v1824_v1 = vadd.f32 %v1823_v0, %v1774_v42  ;;  %v1782_v0 = vmul.f32 %v3548_v18, %v1526_v27  ;;  %v1530_v42 = vmax.f32 %v3456_v62, 0.0 }
 0x2ce   :  { %v1301_v19 = vpop.f32.mrf.mxu3 }
 0x2cf   :  { %v1302_v20 = vadd.f32 %v1301_v19, %v1213_v49  ;;  %v1825_v60 = vadd.f32 %v1824_v1, %v1776_v14  ;;  %v1784_v14 = vmul.f32 %v3554_v53, %v1528_v55  ;;  %v3592_v19 = vpop.permute.xlu0 %1705  ;;  %v3596_v27 = vpop.f32.mrf.mxu2 }
 0x2d0   :  { %3841 = vst [vmem:[#allocation18_spill] sm:$0xff] %v3592_v19  ;;  %v3606_v37 = vpop.permute.xlu2 %1715 }
 0x2d1   :  { %v1826_v24 = vadd.f32 %v1825_v60, %v1778_v13  ;;  %1392 = vmatmul.bf16.gmra.mxu2 %v3838_v4  ;;  %v1786_v60 = vmul.f32 %v3563_v54, %v1530_v42  ;;  %v1534_v4 = vmax.f32 %v3478_v21, 0.0 }
 0x2d3   :  { %1441 = vmatmul.bf16.gmra.mxu3 %v3839_v52  ;;  %v1827_v49 = vadd.f32 %v1826_v24, %v1780_v57  ;;  %v3598_v57 = vpop.permute.xlu1 %1710  ;;  %v3843_v24 = vld [vmem:[#allocation51_spill] sm:$0xff]  ;;  %v1790_v5 = vmul.f32 %v3576_v11, %v1534_v4 }
 0x2d4   :  { %3842 = vst [vmem:[#allocation34_spill] sm:$0xff] %v3598_v57  ;;  %v1536_v55 = vmax.f32 %v3843_v24, 0.0 }
 0x2d5   :  { %v1828_v34 = vadd.f32 %v1827_v49, %v1782_v0  ;;  %v1538_v0 = vmax.f32 %v3504_v26, 0.0 }
 0x2d6   :  { %v1304_v1 = vpop.f32.mrf.mxu3  ;;  %v1792_v21 = vmul.f32 %v3584_v25, %v1536_v55  ;;  %v3846_v55 = vld [vmem:[#allocation6_spill] sm:$0xff] }
 0x2d7   :  { %v1305_v13 = vadd.f32 %v1304_v1, %v1216_v33  ;;  %v1829_v62 = vadd.f32 %v1828_v34, %v1784_v14  ;;  %v3844_v33 = vld [vmem:[#allocation39_spill] sm:$0xff]  ;;  %v3845_v1 = vld [vmem:[#allocation46_spill] sm:$0xff]  ;;  %v1540_v14 = vmax.f32 %v3522_v63, 0.0  ;;  %v1794_v24 = vmul.f32 %v3592_v19, %v1538_v0  ;;  %v3614_v26 = vpop.f32.mrf.mxu2 }
 0x2d8   :  { %v1218_v42 = vadd.f32 %v3845_v1, %v3844_v33  ;;  %v1546_v0 = vmax.f32 %v1302_v20, 0.0 }
 0x2d9   :  { %v1830_v52 = vadd.f32 %v1829_v62, %v1786_v60  ;;  %v1542_v60 = vmax.f32 %v3541_v51, 0.0  ;;  %v3612_v62 = vpop.permute.xlu0 %1720 }
 0x2db   :  { %v1831_v49 = vadd.f32 %v1830_v52, %v1788_v41  ;;  %v1796_v41 = vmul.f32 %v3598_v57, %v1540_v14  ;;  %v1544_v52 = vmax.f32 %v3560_v45, 0.0  ;;  %v3619_v63 = vpop.permute.xlu1 %1725  ;;  %v1548_v14 = vmax.f32 %v1305_v13, 0.0  ;;  %v3853_v13 = vld [vmem:[#allocation41_spill] sm:$0xff] }
 0x2dd   :  { %v1832_v34 = vadd.f32 %v1831_v49, %v1790_v5  ;;  %v3847_v5 = vld [vmem:[#allocation7_spill] sm:$0xff]  ;;  %v3848_v49 = vld [vmem:[#allocation40_spill] sm:$0xff] }
 0x2de   :  { %v1306_v15 = vpop.f32.mrf.mxu3 }
 0x2df   :  { %v1307_v56 = vadd.f32 %v1306_v15, %v1218_v42  ;;  %v1833_v4 = vadd.f32 %v1832_v34, %v1792_v21  ;;  %v1798_v15 = vmul.f32 %v3606_v37, %v1542_v60  ;;  %v3849_v42 = vld [vmem:[#allocation47_spill] sm:$0xff]  ;;  %v1800_v34 = vmul.f32 %v3612_v62, %v1544_v52 }
 0x2e0   :  { %v1221_v21 = vadd.f32 %v3849_v42, %v3848_v49 }
 0x2e1   :  { %v1834_v1 = vadd.f32 %v1833_v4, %v1794_v24  ;;  %1397 = vmatmul.bf16.gmra.mxu2 %v3846_v55  ;;  %v3626_v24 = vpop.permute.xlu2 %1730  ;;  %v1802_v4 = vmul.f32 %v3619_v63, %v1546_v0  ;;  %v1550_v19 = vmax.f32 %v1307_v56, 0.0 }
 0x2e2   :  { %3850 = vst [vmem:[#allocation38_spill] sm:$0xff] %v3626_v24  ;;  %v1804_v60 = vmul.f32 %v3626_v24, %v1548_v14  ;;  %v3864_v24 = vld [vmem:[#allocation13_spill] sm:$0xff] }
 0x2e3   :  { %1446 = vmatmul.bf16.gmra.mxu3 %v3847_v5  ;;  %v1835_v51 = vadd.f32 %v1834_v1, %v1796_v41  ;;  %v3630_v41 = vpop.permute.xlu0 %1735  ;;  %v3633_v52 = vpop.permute.xlu1 %1740 }
 0x2e4   :  { %3851 = vst [vmem:[#allocation17_spill] sm:$0xff] %v3630_v41  ;;  %v1806_v42 = vmul.f32 %v3630_v41, %v1550_v19  ;;  %v3858_v19 = vld [vmem:[#allocation49_spill] sm:$0xff] }
 0x2e5   :  { %v1836_v33 = vadd.f32 %v1835_v51, %v1798_v15  ;;  %3852 = vst [vmem:[#allocation42_spill] sm:$0xff] %v3633_v52  ;;  %v3854_v15 = vld [vmem:[#allocation48_spill] sm:$0xff] }
 0x2e6   :  { %v1309_v57 = vpop.f32.mrf.mxu3 }
 0x2e7   :  { %v1310_v45 = vadd.f32 %v1309_v57, %v1221_v21  ;;  %v1837_v55 = vadd.f32 %v1836_v33, %v1800_v34  ;;  %v1223_v57 = vadd.f32 %v3854_v15, %v3853_v13  ;;  %v3862_v13 = vld [vmem:[#allocation44_spill] sm:$0xff] }
 0x2e9   :  { %v1838_v5 = vadd.f32 %v1837_v55, %v1802_v4  ;;  %v1552_v20 = vmax.f32 %v1310_v45, 0.0  ;;  %v3638_v4 = vpop.permute.xlu2 %1745  ;;  %v3856_v45 = vld [vmem:[#allocation9_spill] sm:$0xff]  ;;  %v3857_v55 = vld [vmem:[#allocation10_spill] sm:$0xff] }
 0x2ea   :  { %3855 = vst [vmem:[#allocation8_spill] sm:$0xff] %v3638_v4 }
 0x2eb   :  { %v1839_v1 = vadd.f32 %v1838_v5, %v1804_v60  ;;  %v1808_v21 = vmul.f32 %v3633_v52, %v1552_v20  ;;  %v1324_v5 = vadd.f32 %v3858_v19, %v3857_v55 }
 0x2ed   :  { %v1840_v51 = vadd.f32 %v1839_v1, %v1806_v42  ;;  %v3859_v1 = vld [vmem:[#allocation12_spill] sm:$0xff]  ;;  %v3860_v42 = vld [vmem:[#allocation50_spill] sm:$0xff] }
 0x2ee   :  { %v1311_v0 = vpop.f32.mrf.mxu3  ;;  %v1326_v20 = vadd.f32 %v3860_v42, %v3859_v1  ;;  %v3866_v42 = vld [vmem:[#allocation14_spill] sm:$0xff] }
 0x2ef   :  { %v1312_v33 = vadd.f32 %v1311_v0, %v1223_v57  ;;  %v1841_v56 = vadd.f32 %v1840_v51, %v1808_v21  ;;  %v3861_v0 = vld [vmem:[#allocation43_spill] sm:$0xff] }
 0x2f1   :  { %v1554_v34 = vmax.f32 %v1312_v33, 0.0 }
 0x2f3   :  { %v1810_v14 = vmul.f32 %v3638_v4, %v1554_v34  ;;  %1451 = vmatmul.bf16.gmra.mxu3 %v3856_v45  ;;  %v3863_v4 = vld [vmem:[#allocation11_spill] sm:$0xff]  ;;  %v1343_v45 = vpop.f32.mrf.mxu2 }
 0x2f5   :  { %v3644_v60 = vadd.f32 %v1841_v56, %v1810_v14  ;;  %v1329_v56 = vadd.f32 %v3508_v10, %v3864_v24  ;;  %v1334_v10 = vadd.f32 %v3551_v30, %v3244_v23  ;;  %v1339_v23 = vadd.f32 %v3596_v27, %v3254_v31 }
 0x2f6   :  { %v1412_v41 = vpop.f32.mrf.mxu3  ;;  %v1344_v31 = vadd.f32 %v1343_v45, %v3263_v9 }
 0x2f7   :  { %v1413_v15 = vadd.f32 %v1412_v41, %v1324_v5  ;;  %v3865_v5 = vld [vmem:[#allocation45_spill] sm:$0xff] }
 0x2f9   :  { %v1493_v57 = vmax.f32 %v1413_v15, 0.0 }
 0x2fb   :  { %v1749_v33 = vmul.f32 %v3861_v0, %v1493_v57 }
 0x2fe   :  { %v1414_v52 = vpop.f32.mrf.mxu3 }
 0x2ff   :  { %v1415_v51 = vadd.f32 %v1414_v52, %v1326_v20  ;;  %v1331_v52 = vadd.f32 %v3531_v50, %v3866_v42  ;;  %v1345_v20 = vpop.f32.mrf.mxu2  ;;  %v1336_v50 = vadd.f32 %v3574_v59, %v3252_v6  ;;  %v3868_v42 = vld [vmem:[#allocation16_spill] sm:$0xff]  ;;  %v1341_v6 = vadd.f32 %v3614_v26, %v3259_v2 }
 0x301   :  { %v1495_v21 = vmax.f32 %v1415_v51, 0.0 }
 0x303   :  { %v1751_v34 = vmul.f32 %v3862_v13, %v1495_v21  ;;  %1456 = vmatmul.bf16.gmra.mxu3 %v3863_v4  ;;  %v3867_v21 = vld [vmem:[#allocation15_spill] sm:$0xff] }
 0x305   :  { %v1849_v14 = vadd.f32 %v1751_v34, %v1749_v33 }
 0x306   :  { %v1417_v55 = vpop.f32.mrf.mxu3 }
 0x307   :  { %v1418_v41 = vadd.f32 %v1417_v55, %v1329_v56  ;;  %v1348_v34 = vpop.f32.mrf.mxu2 }
 0x308   :  { %v1349_v9 = vadd.f32 %v1348_v34, %v3283_v32 }
 0x309   :  { %v1497_v19 = vmax.f32 %v1418_v41, 0.0 }
 0x30b   :  { %v1753_v1 = vmul.f32 %v3865_v5, %v1497_v19 }
 0x30d   :  { %v1850_v15 = vadd.f32 %v1849_v14, %v1753_v1 }
 0x30e   :  { %v1419_v57 = vpop.f32.mrf.mxu3 }
 0x30f   :  { %v1420_v51 = vadd.f32 %v1419_v57, %v1331_v52 }
 0x311   :  { %v1499_v13 = vmax.f32 %v1420_v51, 0.0 }
 0x313   :  { %v1755_v4 = vmul.f32 %v3461_v38, %v1499_v13  ;;  %1461 = vmatmul.bf16.gmra.mxu3 %v3867_v21  ;;  %v1350_v38 = vpop.f32.mrf.mxu2 }
 0x315   :  { %v1851_v24 = vadd.f32 %v1850_v15, %v1755_v4 }
 0x316   :  { %v1422_v0 = vpop.f32.mrf.mxu3 }
 0x317   :  { %v1423_v33 = vadd.f32 %v1422_v0, %v1334_v10  ;;  %v3869_v10 = vld [vmem:[#allocation21_spill] sm:$0xff] }
 0x319   :  { %v1501_v56 = vmax.f32 %v1423_v33, 0.0 }
 0x31b   :  { %v1757_v55 = vmul.f32 %v3468_v47, %v1501_v56  ;;  %v1353_v51 = vpop.f32.mrf.mxu2 }
 0x31c   :  { %v1354_v32 = vadd.f32 %v1353_v51, %v3292_v58 }
 0x31d   :  { %v1852_v14 = vadd.f32 %v1851_v24, %v1757_v55  ;;  %v1346_v55 = vadd.f32 %v1345_v20, %v3265_v35  ;;  %v1351_v35 = vadd.f32 %v1350_v38, %v3290_v12 }
 0x31e   :  { %v1424_v41 = vpop.f32.mrf.mxu3 }
 0x31f   :  { %v1425_v19 = vadd.f32 %v1424_v41, %v1336_v50 }
 0x321   :  { %v1503_v5 = vmax.f32 %v1425_v19, 0.0  ;;  %v3870_v19 = vld [vmem:[#allocation26_spill] sm:$0xff] }
 0x323   :  { %v1759_v1 = vmul.f32 %v3470_v8, %v1503_v5  ;;  %1466 = vmatmul.bf16.gmra.mxu3 %v3868_v42  ;;  %v1355_v24 = vpop.f32.mrf.mxu2 }
 0x325   :  { %v1853_v30 = vadd.f32 %v1852_v14, %v1759_v1 }
 0x326   :  { %v1427_v52 = vpop.f32.mrf.mxu3 }
 0x327   :  { %v1428_v15 = vadd.f32 %v1427_v52, %v1339_v23 }
 0x329   :  { %v1505_v57 = vmax.f32 %v1428_v15, 0.0 }
 0x32b   :  { %v1761_v47 = vmul.f32 %v3474_v40, %v1505_v57  ;;  %v1358_v14 = vpop.f32.mrf.mxu2 }
 0x32d   :  { %v1854_v59 = vadd.f32 %v1853_v30, %v1761_v47 }
 0x32e   :  { %v1429_v13 = vpop.f32.mrf.mxu3 }
 0x32f   :  { %v1430_v4 = vadd.f32 %v1429_v13, %v1341_v6 }
 0x331   :  { %v1507_v21 = vmax.f32 %v1430_v4, 0.0 }
 0x333   :  { %v1763_v8 = vmul.f32 %v3480_v3, %v1507_v21  ;;  %1471 = vmatmul.bf16.gmra.mxu3 %v3869_v10  ;;  %v1360_v23 = vpop.f32.mrf.mxu2 }
 0x335   :  { %v1855_v27 = vadd.f32 %v1854_v59, %v1763_v8 }
 0x336   :  { %v1432_v0 = vpop.f32.mrf.mxu3 }
 0x337   :  { %v1433_v33 = vadd.f32 %v1432_v0, %v1344_v31  ;;  %v3872_v31 = vld [vmem:[#allocation37_spill] sm:$0xff] }
 0x339   :  { %v1509_v56 = vmax.f32 %v1433_v33, 0.0 }
 0x33b   :  { %v1765_v40 = vmul.f32 %v3484_v46, %v1509_v56  ;;  %v1363_v47 = vpop.f32.mrf.mxu2 }
 0x33d   :  { %v1856_v2 = vadd.f32 %v1855_v27, %v1765_v40  ;;  %v3873_v27 = vld [vmem:[#allocation19_spill] sm:$0xff] }
 0x33e   :  { %v1434_v26 = vpop.f32.mrf.mxu3  ;;  %v1359_v0 = vadd.f32 %v1358_v14, %v3873_v27 }
 0x33f   :  { %v1435_v50 = vadd.f32 %v1434_v26, %v1346_v55  ;;  %v3874_v55 = vld [vmem:[#allocation20_spill] sm:$0xff] }
 0x341   :  { %v1511_v41 = vmax.f32 %v1435_v50, 0.0 }
 0x343   :  { %v1767_v3 = vmul.f32 %v3490_v36, %v1511_v41  ;;  %1476 = vmatmul.bf16.gmra.mxu3 %v3870_v19  ;;  %v3871_v36 = vld [vmem:[#allocation33_spill] sm:$0xff]  ;;  %v1365_v38 = vpop.f32.mrf.mxu2 }
 0x345   :  { %v1857_v45 = vadd.f32 %v1856_v2, %v1767_v3  ;;  %v3875_v3 = vld [vmem:[#allocation22_spill] sm:$0xff] }
 0x346   :  { %v1437_v5 = vpop.f32.mrf.mxu3  ;;  %v1364_v19 = vadd.f32 %v1363_v47, %v3875_v3  ;;  %v3881_v3 = vld [vmem:[#allocation30_spill] sm:$0xff] }
 0x347   :  { %v1438_v1 = vadd.f32 %v1437_v5, %v1349_v9 }
 0x349   :  { %v1513_v42 = vmax.f32 %v1438_v1, 0.0 }
 0x34b   :  { %v1769_v46 = vmul.f32 %v3494_v16, %v1513_v42  ;;  %v1356_v16 = vadd.f32 %v1355_v24, %v3835_v29  ;;  %v1368_v56 = vpop.f32.mrf.mxu2  ;;  %v1361_v29 = vadd.f32 %v1360_v23, %v3874_v55 }
 0x34d   :  { %v1858_v20 = vadd.f32 %v1857_v45, %v1769_v46  ;;  %v3876_v46 = vld [vmem:[#allocation23_spill] sm:$0xff] }
 0x34e   :  { %v1439_v30 = vpop.f32.mrf.mxu3 }
 0x34f   :  { %v1440_v52 = vadd.f32 %v1439_v30, %v1351_v35 }
 0x351   :  { %v1515_v15 = vmax.f32 %v1440_v52, 0.0 }
 0x353   :  { %v1771_v57 = vmul.f32 %v3500_v48, %v1515_v15  ;;  %1481 = vmatmul.bf16.gmra.mxu3 %v3871_v36  ;;  %v1370_v41 = vpop.f32.mrf.mxu2  ;;  %v3877_v15 = vld [vmem:[#allocation24_spill] sm:$0xff] }
 0x355   :  { %v1859_v34 = vadd.f32 %v1858_v20, %v1771_v57  ;;  %v1369_v57 = vadd.f32 %v1368_v56, %v3877_v15 }
 0x356   :  { %v1442_v6 = vpop.f32.mrf.mxu3 }
 0x357   :  { %v1443_v59 = vadd.f32 %v1442_v6, %v1354_v32 }
 0x359   :  { %v1517_v13 = vmax.f32 %v1443_v59, 0.0  ;;  %v3878_v59 = vld [vmem:[#allocation27_spill] sm:$0xff] }
 0x35b   :  { %v1773_v4 = vmul.f32 %v3510_v43, %v1517_v13  ;;  %v1373_v42 = vpop.f32.mrf.mxu2 }
 0x35d   :  { %v1860_v12 = vadd.f32 %v1859_v34, %v1773_v4 }
 0x35e   :  { %v1444_v21 = vpop.f32.mrf.mxu3 }
 0x35f   :  { %v1445_v8 = vadd.f32 %v1444_v21, %v1356_v16 }
 0x361   :  { %v1519_v10 = vmax.f32 %v1445_v8, 0.0  ;;  %v3879_v8 = vld [vmem:[#allocation28_spill] sm:$0xff] }
 0x363   :  { %v1775_v48 = vmul.f32 %v3518_v39, %v1519_v10  ;;  %1486 = vmatmul.bf16.gmra.mxu3 %v3872_v31  ;;  %v1375_v36 = vpop.f32.mrf.mxu2 }
 0x365   :  { %v1861_v58 = vadd.f32 %v1860_v12, %v1775_v48 }
 0x366   :  { %v1447_v51 = vpop.f32.mrf.mxu3 }
 0x367   :  { %v1448_v33 = vadd.f32 %v1447_v51, %v1359_v0 }
 0x369   :  { %v1521_v40 = vmax.f32 %v1448_v33, 0.0 }
 0x36b   :  { %v1777_v43 = vmul.f32 %v3526_v17, %v1521_v40  ;;  %v1366_v17 = vadd.f32 %v1365_v38, %v3876_v46  ;;  %v1378_v12 = vpop.f32.mrf.mxu2 }
 0x36d   :  { %v1862_v24 = vadd.f32 %v1861_v58, %v1777_v43 }
 0x36e   :  { %v1449_v2 = vpop.f32.mrf.mxu3 }
 0x36f   :  { %v1450_v26 = vadd.f32 %v1449_v2, %v1361_v29 }
 0x371   :  { %v1523_v50 = vmax.f32 %v1450_v26, 0.0 }
 0x373   :  { %v1779_v39 = vmul.f32 %v3533_v44, %v1523_v50  ;;  %v1380_v0 = vpop.f32.mrf.mxu2 }
 0x375   :  { %v1863_v9 = vadd.f32 %v1862_v24, %v1779_v39 }
 0x376   :  { %v1452_v14 = vpop.f32.mrf.mxu3 }
 0x377   :  { %v1453_v45 = vadd.f32 %v1452_v14, %v1364_v19  ;;  %v1379_v19 = vadd.f32 %v1378_v12, %v3881_v3 }
 0x379   :  { %v1525_v5 = vmax.f32 %v1453_v45, 0.0  ;;  %v3882_v45 = vld [vmem:[#allocation31_spill] sm:$0xff] }
 0x37b   :  { %v1781_v1 = vmul.f32 %v3543_v28, %v1525_v5  ;;  %v1371_v28 = vadd.f32 %v1370_v41, %v3878_v59  ;;  %v1383_v33 = vpop.f32.mrf.mxu2  ;;  %v3880_v41 = vld [vmem:[#allocation29_spill] sm:$0xff]  ;;  %v1381_v5 = vadd.f32 %v1380_v0, %v3882_v45 }
 0x37c   :  { %v1376_v39 = vadd.f32 %v1375_v36, %v3880_v41  ;;  %v1843_v41 = vrot.slane %v3644_v60, 4 }
 0x37d   :  { %v1864_v35 = vadd.f32 %v1863_v9, %v1781_v1 }
 0x37e   :  { %v1454_v23 = vpop.f32.mrf.mxu3 }
 0x37f   :  { %v1455_v20 = vadd.f32 %v1454_v23, %v1366_v17 }
 0x381   :  { %v1527_v30 = vmax.f32 %v1455_v20, 0.0 }
 0x383   :  { %v1783_v52 = vmul.f32 %v3548_v18, %v1527_v30  ;;  %v1374_v18 = vadd.f32 %v1373_v42, %v3879_v8  ;;  %v1385_v40 = vpop.f32.mrf.mxu2  ;;  %v3883_v42 = vld [vmem:[#allocation32_spill] sm:$0xff] }
 0x384   :  { %v1384_v46 = vadd.f32 %v1383_v33, %v3883_v42  ;;  %v1386_v23 = vadd.f32 %v1385_v40, %v3374_v7  ;;  %v3886_v7 = vld [vmem:[#allocation18_spill] sm:$0xff] }
 0x385   :  { %v1865_v44 = vadd.f32 %v1864_v35, %v1783_v52 }
 0x386   :  { %v1457_v47 = vpop.f32.mrf.mxu3 }
 0x387   :  { %v1458_v32 = vadd.f32 %v1457_v47, %v1369_v57  ;;  %v3884_v47 = vld [vmem:[#allocation35_spill] sm:$0xff] }
 0x389   :  { %v1529_v34 = vmax.f32 %v1458_v32, 0.0 }
 0x38b   :  { %v1785_v6 = vmul.f32 %v3554_v53, %v1529_v34  ;;  %v1388_v29 = vpop.f32.mrf.mxu2 }
 0x38c   :  { %v1389_v52 = vadd.f32 %v1388_v29, %v3833_v61  ;;  %v3887_v61 = vld [vmem:[#allocation39_spill] sm:$0xff] }
 0x38d   :  { %v1866_v13 = vadd.f32 %v1865_v44, %v1785_v6 }
 0x38e   :  { %v1459_v4 = vpop.f32.mrf.mxu3 }
 0x38f   :  { %v1460_v16 = vadd.f32 %v1459_v4, %v1371_v28  ;;  %v3885_v28 = vld [vmem:[#allocation36_spill] sm:$0xff] }
 0x391   :  { %v1531_v38 = vmax.f32 %v1460_v16, 0.0 }
 0x393   :  { %v1787_v21 = vmul.f32 %v3563_v54, %v1531_v38  ;;  %v1390_v2 = vpop.f32.mrf.mxu2 }
 0x394   :  { %v1391_v32 = vadd.f32 %v1390_v2, %v3884_v47  ;;  %v1890_v47 = vpop.permute.xlu0 %1889 }
 0x395   :  { %v1867_v10 = vadd.f32 %v1866_v13, %v1787_v21 }
 0x396   :  { %v1462_v48 = vpop.f32.mrf.mxu3 }
 0x397   :  { %v1463_v31 = vadd.f32 %v1462_v48, %v1374_v18  ;;  %v3888_v18 = vld [vmem:[#allocation34_spill] sm:$0xff] }
 0x399   :  { %v1533_v27 = vmax.f32 %v1463_v31, 0.0 }
 0x39b   :  { %v1789_v58 = vmul.f32 %v3568_v22, %v1533_v27  ;;  %v1393_v26 = vpop.f32.mrf.mxu2 }
 0x39c   :  { %v1394_v13 = vadd.f32 %v1393_v26, %v3885_v28  ;;  %v3889_v26 = vld [vmem:[#allocation38_spill] sm:$0xff]  ;;  %v1901_v28 = vlaneseq }
 0x39d   :  { %v1868_v51 = vadd.f32 %v1867_v10, %v1789_v58 }
 0x39e   :  { %v1464_v53 = vpop.f32.mrf.mxu3  ;;  %vm1903_vm2 = vcmp.lt.s32.totalorder %v1901_v28, 256 }
 0x39f   :  { %v1465_v9 = vadd.f32 %v1464_v53, %v1376_v39 }
 0x3a1   :  { %v1535_v17 = vmax.f32 %v1465_v9, 0.0 }
 0x3a3   :  { %v1395_v14 = vpop.f32.mrf.mxu2  ;;  %v1791_v15 = vmul.f32 %v3576_v11, %v1535_v17  ;;  %v3893_v17 = vld [vmem:[#allocation8_spill] sm:$0xff] }
 0x3a4   :  { %v1396_v8 = vadd.f32 %v1395_v14, %v3887_v61 }
 0x3a5   :  { %v1869_v16 = vadd.f32 %v1868_v51, %v1791_v15 }
 0x3a6   :  { %v1467_v56 = vpop.f32.mrf.mxu3 }
 0x3a7   :  { %v1468_v1 = vadd.f32 %v1467_v56, %v1379_v19  ;;  %v3891_v19 = vld [vmem:[#allocation17_spill] sm:$0xff] }
 0x3a9   :  { %v1537_v20 = vmax.f32 %v1468_v1, 0.0 }
 0x3ab   :  { %v1793_v34 = vmul.f32 %v3584_v25, %v1537_v20  ;;  %v1398_v4 = vpop.f32.mrf.mxu2 }
 0x3ac   :  { %v1399_v27 = vadd.f32 %v1398_v4, %v3848_v49 }
 0x3ad   :  { %v1870_v11 = vadd.f32 %v1869_v16, %v1793_v34  ;;  %v1892_v34 = vperm.slane %v1890_v47, 0 }
 0x3ae   :  { %v1469_v43 = vpop.f32.mrf.mxu3 }
 0x3af   :  { %v1470_v35 = vadd.f32 %v1469_v43, %v1381_v5 }
 0x3b1   :  { %v1539_v57 = vmax.f32 %v1470_v35, 0.0 }
 0x3b3   :  { %v1795_v12 = vmul.f32 %v3886_v7, %v1539_v57  ;;  %v1400_v2 = vpop.f32.mrf.mxu2 }
 0x3b5   :  { %v1871_v25 = vadd.f32 %v1870_v11, %v1795_v12 }
 0x3b6   :  { %v1472_v55 = vpop.f32.mrf.mxu3 }
 0x3b7   :  { %v1473_v30 = vadd.f32 %v1472_v55, %v1384_v46 }
 0x3b9   :  { %v1541_v6 = vmax.f32 %v1473_v30, 0.0 }
 0x3bb   :  { %v1797_v10 = vmul.f32 %v3888_v18, %v1541_v6 }
 0x3bd   :  { %v1872_v51 = vadd.f32 %v1871_v25, %v1797_v10 }
 0x3be   :  { %v1474_v24 = vpop.f32.mrf.mxu3 }
 0x3bf   :  { %v1475_v44 = vadd.f32 %v1474_v24, %v1386_v23 }
 0x3c1   :  { %v1543_v38 = vmax.f32 %v1475_v44, 0.0 }
 0x3c3   :  { %v1799_v0 = vmul.f32 %v3606_v37, %v1543_v38  ;;  %v3890_v37 = vld [vmem:[#allocation41_spill] sm:$0xff] }
 0x3c4   :  { %v1401_v39 = vadd.f32 %v1400_v2, %v3890_v37 }
 0x3c5   :  { %v1873_v55 = vadd.f32 %v1872_v51, %v1799_v0 }
 0x3c6   :  { %v1477_v54 = vpop.f32.mrf.mxu3 }
 0x3c7   :  { %v1478_v59 = vadd.f32 %v1477_v54, %v1389_v52 }
 0x3c9   :  { %v1545_v48 = vmax.f32 %v1478_v59, 0.0 }
 0x3cb   :  { %v1801_v56 = vmul.f32 %v3612_v62, %v1545_v48 }
 0x3cd   :  { %v1874_v54 = vadd.f32 %v1873_v55, %v1801_v56 }
 0x3ce   :  { %v1479_v50 = vpop.f32.mrf.mxu3 }
 0x3cf   :  { %v1480_v21 = vadd.f32 %v1479_v50, %v1391_v32 }
 0x3d1   :  { %v1547_v58 = vmax.f32 %v1480_v21, 0.0 }
 0x3d3   :  { %v1803_v29 = vmul.f32 %v3619_v63, %v1547_v58  ;;  %v1844_v63 = vadd.f32 %v1843_v41, %v3644_v60 }
 0x3d5   :  { %v1875_v3 = vadd.f32 %v1874_v54, %v1803_v29  ;;  %v1845_v23 = vrot.slane %v1844_v63, 2 }
 0x3d6   :  { %v1482_v22 = vpop.f32.mrf.mxu3 }
 0x3d7   :  { %v1483_v31 = vadd.f32 %v1482_v22, %v1394_v13  ;;  %v3892_v22 = vld [vmem:[#allocation42_spill] sm:$0xff]  ;;  %v1846_v52 = vadd.f32 %v1845_v23, %v1844_v63 }
 0x3d9   :  { %v1549_v40 = vmax.f32 %v1483_v31, 0.0  ;;  %v1847_v44 = vrot.slane %v1846_v52, 1 }
 0x3db   :  { %v1805_v50 = vmul.f32 %v3889_v26, %v1549_v40  ;;  %v1848_v59 = vadd.f32 %v1847_v44, %v1846_v52 }
 0x3dd   :  { %v1876_v62 = vadd.f32 %v1875_v3, %v1805_v50  ;;  %v1893_v13 = vadd.f32 %v1892_v34, %v1848_v59 }
 0x3de   :  { %v1484_v36 = vpop.f32.mrf.mxu3 }
 0x3df   :  { %v1485_v53 = vadd.f32 %v1484_v36, %v1396_v8 }
 0x3e1   :  { %v1551_v24 = vmax.f32 %v1485_v53, 0.0 }
 0x3e3   :  { %v1807_v9 = vmul.f32 %v3891_v19, %v1551_v24 }
 0x3e5   :  { %v1877_v1 = vadd.f32 %v1876_v62, %v1807_v9 }
 0x3e6   :  { %v1487_v33 = vpop.f32.mrf.mxu3 }
 0x3e7   :  { %v1488_v43 = vadd.f32 %v1487_v33, %v1399_v27 }
 0x3e9   :  { %v1553_v49 = vmax.f32 %v1488_v43, 0.0 }
 0x3eb   :  { %v1809_v45 = vmul.f32 %v3892_v22, %v1553_v49 }
 0x3ed   :  { %v1878_v46 = vadd.f32 %v1877_v1, %v1809_v45 }
 0x3ee   :  { %v1489_v14 = vpop.f32.mrf.mxu3 }
 0x3ef   :  { %v1490_v5 = vadd.f32 %v1489_v14, %v1401_v39 }
 0x3f1   :  { %v1555_v42 = vmax.f32 %v1490_v5, 0.0 }
 0x3f3   :  { %v1811_v35 = vmul.f32 %v3893_v17, %v1555_v42 }
 0x3f5   :  { %v1879_v20 = vadd.f32 %v1878_v46, %v1811_v35 }
 0x3f7   :  { %v1880_v30 = vrot.slane %v1879_v20, 4 }
 0x3f9   :  { %v1881_v15 = vadd.f32 %v1880_v30, %v1879_v20 }
 0x3fb   :  { %v1882_v57 = vrot.slane %v1881_v15, 2 }
 0x3fd   :  { %v1883_v36 = vadd.f32 %v1882_v57, %v1881_v15 }
 0x3ff   :  { %v1884_v32 = vrot.slane %v1883_v36, 1 }
 0x401   :  { %v1885_v6 = vadd.f32 %v1884_v32, %v1883_v36 }
 0x403   :  { %v1894_v60 = vadd.f32 %v1892_v34, %v1885_v6 }
 0x405   :  { %v1897_v4 = vrot.slane %v1894_v60, 7 }
 0x407   :  { %v1899_v16 = vsel %vm1898_vm1, %v1893_v13, %v1897_v4 }
 0x408   :  { %1905 = vst.msk [vmem:[#allocation3] sm:$0x3] %vm1903_vm2, %v1899_v16 }
 0x409   :  { %1916 = dma.vmem_to_hbm [thread:$0]  %s1912_s18, 32, %s1914_s4, [#allocation4]  }
 0x40a   :  { %2239 = dma.done.wait [#allocation4], 32  }
 0x40b   :  { %2240 = vsyncadd [#allocation4], 4294967264 }
 0x40c   :  { %1921 = vsyncpa [#allocation4], 1 }

</bundles_post_ra>
